<compile_context>
chip_gen: v6e
topology: v6e:2x2x1
jax: 0.10.0
libtpu: 0.0.40
codegen_flags: <defaults>
</compile_context>

<pallas_src>
import functools

import jax
import jax.numpy as jnp
from jax.experimental import pallas as pl
from jax.experimental.pallas import tpu as pltpu

LANE = 128        # feature dims padded to multiples of 128 (lane-dense)
NODE_ALIGN = 512  # node dim padded to a multiple of 512 (large A tiles)


# ----------------------------------------------------------------------------
# helpers
# ----------------------------------------------------------------------------
def _round_up(x, m):
    return (x + m - 1) // m * m


def _pad2d(a, rows, cols):
    r, c = a.shape
    return jnp.pad(a, ((0, rows - r), (0, cols - c)))


def _vmem_limit(resident_bytes):
    """2x the actual resident set (+1 MiB), clamped to 3/4 of this chip's VMEM."""
    cap = 64 << 20  # conservative default (v7x)
    try:
        info = pltpu.get_tpu_info()
        cap = int(getattr(info, "vmem_capacity_bytes", cap)) or cap
    except Exception:
        pass
    want = 2 * resident_bytes + (1 << 20)
    return int(min(max(want, 8 << 20), (3 * cap) // 4))


def _pick_tiles(n_p):
    # >= 2 row blocks whenever possible (keeps both v7x TensorCores streaming);
    # tk as large as divides n_p (512+ already reaches ~85% of HBM roofline).
    tm = 512 if n_p >= 1024 else 256
    tk = next(t for t in (4096, 2048, 1024, 512) if n_p % t == 0)
    return tm, tk


# ----------------------------------------------------------------------------
# Fused GCN layer kernel:
#   o[i, :] = maybe_relu( dinv[i] * sum_k (A+I)[i, k-block] @ (x[k-block] @ W) + b )
# where x has already been pre-scaled by dinv on the input side.
# Grid = (row blocks, k blocks); f32 output block doubles as the accumulator.
# ----------------------------------------------------------------------------
def _gcn_layer_kernel(a_ref, x_ref, w_ref, dinv_ref, b_ref, o_ref,
                      *, tk, x_resident, apply_relu):
    k = pl.program_id(1)

    @pl.when(k == 0)
    def _():
        o_ref[...] = jnp.zeros_like(o_ref)

    if x_resident:
        start = pl.multiple_of(k * tk, tk)
        x_blk = x_ref[pl.ds(start, tk), :]          # slice of the resident X
    else:
        x_blk = x_ref[...]                          # streamed (tk, f) block

    # Feature transform on the fly (W is VMEM-resident), bf16 MXU, f32 acc.
    xw = jnp.dot(x_blk, w_ref[...],
                 preferred_element_type=jnp.float32).astype(jnp.bfloat16)
    # int8 (A+I) counts -> bf16 right before the MXU (exact 0/1/2... values).
    a = a_ref[...].astype(jnp.bfloat16)
    o_ref[...] += jnp.dot(a, xw, preferred_element_type=jnp.float32)

    @pl.when(k == pl.num_programs(1) - 1)
    def _():
        out = o_ref[...] * dinv_ref[...] + b_ref[...]   # output-side D^{-1/2}
        if apply_relu:
            out = jnp.maximum(out, 0.0)
        o_ref[...] = out


def _gcn_layer(adj, x, w, dinv_col, b, *, tm, tk, apply_relu,
               x_vmem_budget=16 << 20):
    n_p = adj.shape[0]
    f = x.shape[1]
    d = w.shape[1]

    # Keep X fully VMEM-resident (read from HBM once) whenever it fits the
    # budget; otherwise stream (tk, f) blocks per k step.
    x_full_bytes = 2 * n_p * f * x.dtype.itemsize        # double-buffered
    x_resident = x_full_bytes <= x_vmem_budget
    if x_resident:
        x_spec = pl.BlockSpec((n_p, f), lambda i, k: (0, 0))
        x_bytes = x_full_bytes
    else:
        x_spec = pl.BlockSpec((tk, f), lambda i, k: (k, 0))
        x_bytes = 2 * tk * f * x.dtype.itemsize

    resident = (
        2 * tm * tk * adj.dtype.itemsize      # A tile (int8), double-buffered
        + x_bytes                             # X
        + 2 * f * d * w.dtype.itemsize        # W (constant block)
        + 2 * tm * 4 + 2 * d * 4              # dinv column + bias row
        + 2 * tm * d * 4                      # f32 output/accumulator block
    )

    kernel = functools.partial(_gcn_layer_kernel, tk=tk,
                               x_resident=x_resident, apply_relu=apply_relu)
    return pl.pallas_call(
        kernel,
        out_shape=jax.ShapeDtypeStruct((n_p, d), jnp.float32),
        grid_spec=pltpu.PrefetchScalarGridSpec(
            num_scalar_prefetch=0,
            grid=(n_p // tm, n_p // tk),
            in_specs=[
                pl.BlockSpec((tm, tk), lambda i, k: (i, k)),   # A (int8)
                x_spec,                                        # X / h1 (bf16)
                pl.BlockSpec((f, d), lambda i, k: (0, 0)),     # W (bf16)
                pl.BlockSpec((tm, 1), lambda i, k: (i, 0)),    # dinv (f32)
                pl.BlockSpec((1, d), lambda i, k: (0, 0)),     # bias (f32)
            ],
            out_specs=pl.BlockSpec((tm, d), lambda i, k: (i, 0)),
        ),
        compiler_params=pltpu.CompilerParams(
            dimension_semantics=("parallel", "arbitrary"),
            vmem_limit_bytes=_vmem_limit(resident),
        ),
    )(adj, x, w, dinv_col, b)


# ----------------------------------------------------------------------------
# Glue: unnormalized (A + I) in int8 + f32 D^{-1/2}, padding, full forward.
# ----------------------------------------------------------------------------
def build_adj_and_dinv(edge_index, num_nodes, padded_nodes):
    """(A + I) as exact integer counts (rows = dst) plus f32 D^{-1/2}.

    Duplicate edges are summed (matches PyG only for deduplicated edge_index).
    Padded nodes get no self-loop, so their rows, columns and dinv are zero.
    """
    src, dst = edge_index[0], edge_index[1]
    adj = jnp.zeros((padded_nodes, padded_nodes), jnp.float32)
    adj = adj.at[dst, src].add(1.0)                       # message src -> dst
    node = jnp.arange(num_nodes)
    adj = adj.at[node, node].add(1.0)                     # self loops (real nodes)
    deg = adj.sum(axis=1)
    dinv = jnp.where(deg > 0, jax.lax.rsqrt(deg), 0.0)
    # TODO(synk): build (A+I) directly in int8 from the edge list and, for large
    # sparse graphs, replace the dense A stream with a PrefetchScalarGridSpec
    # block-sparse gather over per-row-block nonzero column tables.
    return adj.astype(jnp.int8), dinv.astype(jnp.float32)


def _prepare(x, edge_index, w1, b1, w2, b2):
    n, f_in = x.shape
    d1, d2 = w1.shape[1], w2.shape[1]
    n_p = _round_up(max(n, 1), NODE_ALIGN)
    f_p = _round_up(f_in, LANE)
    d1_p = _round_up(d1, LANE)
    d2_p = _round_up(d2, LANE)

    adj, dinv = build_adj_and_dinv(edge_index, n, n_p)
    x_p = _pad2d(x, n_p, f_p)                                # f32 (scaled later)
    w1_p = _pad2d(w1, f_p, d1_p).astype(jnp.bfloat16)
    w2_p = _pad2d(w2, d1_p, d2_p).astype(jnp.bfloat16)
    b1_p = _pad2d(b1, 1, d1_p).astype(jnp.float32)
    b2_p = _pad2d(b2, 1, d2_p).astype(jnp.float32)
    return adj, dinv, x_p, w1_p, b1_p, w2_p, b2_p


def gcn_emb(x, edge_index, w1, b1, w2, b2, *, x_vmem_budget=16 << 20):
    n = x.shape[0]
    d2 = w2.shape[1]
    adj, dinv, x_p, w1_p, b1_p, w2_p, b2_p = _prepare(x, edge_index, w1, b1, w2, b2)
    n_p = adj.shape[0]
    dinv_col = dinv[:, None]                                 # (n_p, 1) f32
    tm, tk = _pick_tiles(n_p)

    # Fold the input-side D^{-1/2} into X (f32 scale, then bf16 for the MXU).
    x_in = (dinv_col * x_p).astype(jnp.bfloat16)
    # Layer 1: GCNConv + ReLU (fused transform + aggregation)
    h1 = _gcn_layer(adj, x_in, w1_p, dinv_col, b1_p, tm=tm, tk=tk,
                    apply_relu=True, x_vmem_budget=x_vmem_budget)
    # Input-side D^{-1/2} for layer 2 (tiny elementwise op vs the A stream).
    h1_in = (dinv_col * h1).astype(jnp.bfloat16)
    # Layer 2: GCNConv (no activation)
    out_p = _gcn_layer(adj, h1_in, w2_p, dinv_col, b2_p, tm=tm, tk=tk,
                       apply_relu=False, x_vmem_budget=x_vmem_budget)
    # Padded rows/cols hold bias garbage by construction -> keep this slice.
    return out_p[:n, :d2]


# ----------------------------------------------------------------------------
# References
# ----------------------------------------------------------------------------
def build_a_hat_f32(edge_index, num_nodes):
    src, dst = edge_index[0], edge_index[1]
    adj = jnp.zeros((num_nodes, num_nodes), jnp.float32)
    adj = adj.at[dst, src].add(1.0)
    adj = adj + jnp.eye(num_nodes, dtype=jnp.float32)
    deg = adj.sum(axis=1)
    dinv = jnp.where(deg > 0, jax.lax.rsqrt(deg), 0.0)
    return dinv[:, None] * adj * dinv[None, :]


def reference_f32(a_hat, x, w1, b1, w2, b2):
    h1 = jnp.maximum(a_hat @ (x @ w1) + b1, 0.0)
    return a_hat @ (h1 @ w2) + b2


def reference_kernel_numerics(adj_i8, dinv, x_p, w1_p, b1_p, w2_p, b2_p):
    """JAX model of the exact kernel numerics (bf16 MXU inputs, f32 acc)."""
    f32 = jnp.float32
    a = adj_i8.astype(jnp.bfloat16)
    dcol = dinv[:, None]
    x_in = (dcol * x_p).astype(jnp.bfloat16)
    xw1 = jnp.dot(x_in, w1_p, preferred_element_type=f32).astype(jnp.bfloat16)
    h1 = jnp.maximum(dcol * jnp.dot(a, xw1, preferred_element_type=f32) + b1_p, 0.0)
    h1_in = (dcol * h1).astype(jnp.bfloat16)
    xw2 = jnp.dot(h1_in, w2_p, preferred_element_type=f32).astype(jnp.bfloat16)
    return dcol * jnp.dot(a, xw2, preferred_element_type=f32) + b2_p


def glorot(key, fan_in, fan_out):
    limit = jnp.sqrt(6.0 / (fan_in + fan_out))
    return jax.random.uniform(key, (fan_in, fan_out), jnp.float32, -limit, limit)


if __name__ == "__main__":
    # GCN_EMB(num_node_features=8, gcn_dim=[32, 16], conv_type='gcnconv')
    # (dropout only applies to the chebconv path, so it is a no-op here).
    num_nodes = 16
    num_node_features = 8
    gcn_dim = (32, 16)

    key = jax.random.PRNGKey(0)
    kx, kw1, kw2 = jax.random.split(key, 3)

    x = jax.random.normal(kx, (num_nodes, num_node_features), jnp.float32)

    # Deterministic edge set: a ring plus chords (undirected -> both directions).
    ring_src = jnp.arange(num_nodes)
    ring_dst = (ring_src + 1) % num_nodes
    chord_src = jnp.array([0, 2, 4, 6], dtype=jnp.int32)
    chord_dst = jnp.array([8, 10, 12, 14], dtype=jnp.int32)
    src = jnp.concatenate([ring_src, ring_dst, chord_src, chord_dst])
    dst = jnp.concatenate([ring_dst, ring_src, chord_dst, chord_src])
    edge_index = jnp.stack([src, dst]).astype(jnp.int32)

    w1 = glorot(kw1, num_node_features, gcn_dim[0])
    b1 = jnp.zeros((1, gcn_dim[0]), jnp.float32)
    w2 = glorot(kw2, gcn_dim[0], gcn_dim[1])
    b2 = jnp.zeros((1, gcn_dim[1]), jnp.float32)

    out = jax.jit(gcn_emb)(x, edge_index, w1, b1, w2, b2)
    out = jax.block_until_ready(out)
    assert out.shape == (num_nodes, gcn_dim[1])

    # Also exercise the streamed-X code path (X not VMEM-resident).
    out_stream = jax.jit(functools.partial(gcn_emb, x_vmem_budget=0))(
        x, edge_index, w1, b1, w2, b2)
    out_stream = jax.block_until_ready(out_stream)
    assert jnp.allclose(out, out_stream, atol=1e-5, rtol=1e-5), \
        "resident-X vs streamed-X mismatch"

    # Tight check against a JAX model of the exact kernel numerics.
    adj, dinv, x_p, w1_p, b1_p, w2_p, b2_p = _prepare(x, edge_index, w1, b1, w2, b2)
    ref_emul = reference_kernel_numerics(adj, dinv, x_p, w1_p, b1_p, w2_p, b2_p)
    ref_emul = ref_emul[:num_nodes, : gcn_dim[1]]
    assert jnp.allclose(out, ref_emul, atol=2e-2, rtol=2e-2), \
        "mismatch vs kernel-numerics reference"

    # Loose check against the pure-f32 reference (bf16 operands => ~1% error).
    a_f32 = build_a_hat_f32(edge_index, num_nodes)
    ref_f32 = reference_f32(a_f32, x, w1, b1, w2, b2)
    assert jnp.allclose(out, ref_f32, atol=8e-2, rtol=8e-2), \
        "mismatch vs f32 reference"

    print("KERNEL_OK")
</pallas_src>

<mosaic_0001>
module attributes {stable_mosaic.version = 11 : i64} {
  func.func private @main(%arg0: i32) attributes {dimension_semantics = [#tpu.dimension_semantics<core_parallel>], iteration_bounds = array<i64: 2>, tpu.core_type = #tpu.core_type<sc_scalar_subcore>, window_params = []} {
    return
  }
}

module attributes {stable_mosaic.version = 11 : i64} {
  func.func private @main(%arg0: i32) attributes {dimension_semantics = [#tpu.dimension_semantics<core_parallel>], iteration_bounds = array<i64: 2>, tpu.core_type = #tpu.core_type<sc_scalar_subcore>, window_params = []} {
    return
  }
}

module attributes {stable_mosaic.version = 11 : i64} {
  func.func @_gcn_layer_kernel(%arg0: i32, %arg1: i32, %arg2: memref<256x512xi8, #tpu.memory_space<vmem>>, %arg3: memref<512x128xbf16, #tpu.memory_space<vmem>>, %arg4: memref<128x128xbf16, #tpu.memory_space<vmem>>, %arg5: memref<256x1xf32, #tpu.memory_space<vmem>>, %arg6: memref<1x128xf32, #tpu.memory_space<vmem>>, %arg7: memref<256x128xf32, #tpu.memory_space<vmem>>) attributes {dimension_semantics = [#tpu.dimension_semantics<parallel>, #tpu.dimension_semantics<arbitrary>], iteration_bounds = array<i64: 2, 1>, scalar_prefetch = 0 : i64, scratch_operands = 0 : i64, tpu.core_type = #tpu.core_type<tc>, window_params = [{transform_indices = @transform_0, window_bounds = array<i64: 256, 512>}, {pipeline_mode = #tpu.pipeline_mode<synchronous>, transform_indices = @transform_1, window_bounds = array<i64: 512, 128>}, {pipeline_mode = #tpu.pipeline_mode<synchronous>, transform_indices = @transform_2, window_bounds = array<i64: 128, 128>}, {transform_indices = @transform_3, window_bounds = array<i64: 256, 1>}, {pipeline_mode = #tpu.pipeline_mode<synchronous>, transform_indices = @transform_4, window_bounds = array<i64: 1, 128>}, {transform_indices = @transform_5, window_bounds = array<i64: 256, 128>}]} {
    %c0_i32 = arith.constant 0 : i32
    %0 = arith.cmpi eq, %arg1, %c0_i32 : i32
    %1 = arith.extui %0 : i1 to i32
    %c0_i32_0 = arith.constant 0 : i32
    %2 = arith.cmpi ne, %1, %c0_i32_0 : i32
    scf.if %2 {
      %cst_12 = arith.constant 0.000000e+00 : f32
      %19 = vector.broadcast %cst_12 : f32 to vector<256x128xf32>
      %c0_13 = arith.constant 0 : index
      %c0_14 = arith.constant 0 : index
      %20 = vector.load %arg7[%c0_13, %c0_14] : memref<256x128xf32, #tpu.memory_space<vmem>>, vector<256x128xf32>
      tpu.vector_store %arg7[%c0_13, %c0_14], %19 {strides = array<i32>} : memref<256x128xf32, #tpu.memory_space<vmem>>, vector<256x128xf32>,
    } else {
    }
    %c512_i32 = arith.constant 512 : i32
    %3 = arith.muli %arg1, %c512_i32 : i32
    %4 = tpu.assume_multiple %3, 512 : i32
    %5 = arith.index_cast %4 : i32 to index
    %c0 = arith.constant 0 : index
    %6 = vector.load %arg3[%5, %c0] : memref<512x128xbf16, #tpu.memory_space<vmem>>, vector<512x128xbf16>
    %c0_1 = arith.constant 0 : index
    %c0_2 = arith.constant 0 : index
    %7 = vector.load %arg4[%c0_1, %c0_2] : memref<128x128xbf16, #tpu.memory_space<vmem>>, vector<128x128xbf16>
    %cst = arith.constant dense<0.000000e+00> : vector<512x128xf32>
    %8 = tpu.matmul %6, %7, %cst {dimension_numbers = #tpu.dot_dimension_numbers<[1], [0], [0], [1], [0, 0, 1, 1], [], []>} : vector<512x128xbf16>, vector<128x128xbf16>, vector<512x128xf32> -> vector<512x128xf32>
    %9 = arith.truncf %8 : vector<512x128xf32> to vector<512x128xbf16>
    %c0_3 = arith.constant 0 : index
    %c0_4 = arith.constant 0 : index
    %10 = vector.load %arg2[%c0_3, %c0_4] : memref<256x512xi8, #tpu.memory_space<vmem>>, vector<256x512xi8>
    %11 = arith.sitofp %10 : vector<256x512xi8> to vector<256x512xbf16>
    %c0_5 = arith.constant 0 : index
    %c0_6 = arith.constant 0 : index
    %12 = vector.load %arg7[%c0_5, %c0_6] : memref<256x128xf32, #tpu.memory_space<vmem>>, vector<256x128xf32>
    %cst_7 = arith.constant dense<0.000000e+00> : vector<256x128xf32>
    %13 = tpu.matmul %11, %9, %cst_7 {dimension_numbers = #tpu.dot_dimension_numbers<[1], [0], [0], [1], [0, 0, 1, 1], [], []>} : vector<256x512xbf16>, vector<512x128xbf16>, vector<256x128xf32> -> vector<256x128xf32>
    %14 = arith.addf %12, %13 : vector<256x128xf32>
    %c0_8 = arith.constant 0 : index
    %c0_9 = arith.constant 0 : index
    %15 = vector.load %arg7[%c0_8, %c0_9] : memref<256x128xf32, #tpu.memory_space<vmem>>, vector<256x128xf32>
    tpu.vector_store %arg7[%c0_8, %c0_9], %14 {strides = array<i32>} : memref<256x128xf32, #tpu.memory_space<vmem>>, vector<256x128xf32>,
    %c0_i32_10 = arith.constant 0 : i32
    %16 = arith.cmpi eq, %arg1, %c0_i32_10 : i32
    %17 = arith.extui %16 : i1 to i32
    %c0_i32_11 = arith.constant 0 : i32
    %18 = arith.cmpi ne, %17, %c0_i32_11 : i32
    scf.if %18 {
      %c0_12 = arith.constant 0 : index
      %c0_13 = arith.constant 0 : index
      %19 = vector.load %arg7[%c0_12, %c0_13] : memref<256x128xf32, #tpu.memory_space<vmem>>, vector<256x128xf32>
      %c0_14 = arith.constant 0 : index
      %c0_15 = arith.constant 0 : index
      %20 = vector.load %arg5[%c0_14, %c0_15] : memref<256x1xf32, #tpu.memory_space<vmem>>, vector<256x1xf32>
      %21 = vector.broadcast %20 : vector<256x1xf32> to vector<256x128xf32>
      %22 = arith.mulf %19, %21 : vector<256x128xf32>
      %c0_16 = arith.constant 0 : index
      %c0_17 = arith.constant 0 : index
      %23 = vector.load %arg6[%c0_16, %c0_17] : memref<1x128xf32, #tpu.memory_space<vmem>>, vector<1x128xf32>
      %24 = vector.broadcast %23 : vector<1x128xf32> to vector<256x128xf32>
      %25 = arith.addf %22, %24 : vector<256x128xf32>
      %c0_18 = arith.constant 0 : index
      %c0_19 = arith.constant 0 : index
      %26 = vector.load %arg7[%c0_18, %c0_19] : memref<256x128xf32, #tpu.memory_space<vmem>>, vector<256x128xf32>
      tpu.vector_store %arg7[%c0_18, %c0_19], %25 {strides = array<i32>} : memref<256x128xf32, #tpu.memory_space<vmem>>, vector<256x128xf32>,
    } else {
    }
    return
  }
  func.func @transform_0(%arg0: i32, %arg1: i32) -> (i32, i32) {
    %c0_i32 = arith.constant 0 : i32
    return %arg0, %arg1 : i32, i32
  }
  func.func @transform_1(%arg0: i32, %arg1: i32) -> (i32, i32) {
    %c0_i32 = arith.constant 0 : i32
    %c0_i32_0 = arith.constant 0 : i32
    %c0_i32_1 = arith.constant 0 : i32
    return %c0_i32, %c0_i32_0 : i32, i32
  }
  func.func @transform_2(%arg0: i32, %arg1: i32) -> (i32, i32) {
    %c0_i32 = arith.constant 0 : i32
    %c0_i32_0 = arith.constant 0 : i32
    %c0_i32_1 = arith.constant 0 : i32
    return %c0_i32, %c0_i32_0 : i32, i32
  }
  func.func @transform_3(%arg0: i32, %arg1: i32) -> (i32, i32) {
    %c0_i32 = arith.constant 0 : i32
    %c0_i32_0 = arith.constant 0 : i32
    return %arg0, %c0_i32 : i32, i32
  }
  func.func @transform_4(%arg0: i32, %arg1: i32) -> (i32, i32) {
    %c0_i32 = arith.constant 0 : i32
    %c0_i32_0 = arith.constant 0 : i32
    %c0_i32_1 = arith.constant 0 : i32
    return %c0_i32, %c0_i32_0 : i32, i32
  }
  func.func @transform_5(%arg0: i32, %arg1: i32) -> (i32, i32) {
    %c0_i32 = arith.constant 0 : i32
    %c0_i32_0 = arith.constant 0 : i32
    return %arg0, %c0_i32 : i32, i32
  }
}

module attributes {stable_mosaic.version = 11 : i64} {
  func.func @_gcn_layer_kernel(%arg0: i32, %arg1: i32, %arg2: memref<256x512xi8, #tpu.memory_space<vmem>>, %arg3: memref<512x128xbf16, #tpu.memory_space<vmem>>, %arg4: memref<128x128xbf16, #tpu.memory_space<vmem>>, %arg5: memref<256x1xf32, #tpu.memory_space<vmem>>, %arg6: memref<1x128xf32, #tpu.memory_space<vmem>>, %arg7: memref<256x128xf32, #tpu.memory_space<vmem>>) attributes {dimension_semantics = [#tpu.dimension_semantics<parallel>, #tpu.dimension_semantics<arbitrary>], iteration_bounds = array<i64: 2, 1>, scalar_prefetch = 0 : i64, scratch_operands = 0 : i64, tpu.core_type = #tpu.core_type<tc>, window_params = [{transform_indices = @transform_0, window_bounds = array<i64: 256, 512>}, {pipeline_mode = #tpu.pipeline_mode<synchronous>, transform_indices = @transform_1, window_bounds = array<i64: 512, 128>}, {pipeline_mode = #tpu.pipeline_mode<synchronous>, transform_indices = @transform_2, window_bounds = array<i64: 128, 128>}, {transform_indices = @transform_3, window_bounds = array<i64: 256, 1>}, {pipeline_mode = #tpu.pipeline_mode<synchronous>, transform_indices = @transform_4, window_bounds = array<i64: 1, 128>}, {transform_indices = @transform_5, window_bounds = array<i64: 256, 128>}]} {
    %c0_i32 = arith.constant 0 : i32
    %0 = arith.cmpi eq, %arg1, %c0_i32 : i32
    %1 = arith.extui %0 : i1 to i32
    %c0_i32_0 = arith.constant 0 : i32
    %2 = arith.cmpi ne, %1, %c0_i32_0 : i32
    scf.if %2 {
      %cst_12 = arith.constant 0.000000e+00 : f32
      %19 = vector.broadcast %cst_12 : f32 to vector<256x128xf32>
      %c0_13 = arith.constant 0 : index
      %c0_14 = arith.constant 0 : index
      %20 = vector.load %arg7[%c0_13, %c0_14] : memref<256x128xf32, #tpu.memory_space<vmem>>, vector<256x128xf32>
      tpu.vector_store %arg7[%c0_13, %c0_14], %19 {strides = array<i32>} : memref<256x128xf32, #tpu.memory_space<vmem>>, vector<256x128xf32>,
    } else {
    }
    %c512_i32 = arith.constant 512 : i32
    %3 = arith.muli %arg1, %c512_i32 : i32
    %4 = tpu.assume_multiple %3, 512 : i32
    %5 = arith.index_cast %4 : i32 to index
    %c0 = arith.constant 0 : index
    %6 = vector.load %arg3[%5, %c0] : memref<512x128xbf16, #tpu.memory_space<vmem>>, vector<512x128xbf16>
    %c0_1 = arith.constant 0 : index
    %c0_2 = arith.constant 0 : index
    %7 = vector.load %arg4[%c0_1, %c0_2] : memref<128x128xbf16, #tpu.memory_space<vmem>>, vector<128x128xbf16>
    %cst = arith.constant dense<0.000000e+00> : vector<512x128xf32>
    %8 = tpu.matmul %6, %7, %cst {dimension_numbers = #tpu.dot_dimension_numbers<[1], [0], [0], [1], [0, 0, 1, 1], [], []>} : vector<512x128xbf16>, vector<128x128xbf16>, vector<512x128xf32> -> vector<512x128xf32>
    %9 = arith.truncf %8 : vector<512x128xf32> to vector<512x128xbf16>
    %c0_3 = arith.constant 0 : index
    %c0_4 = arith.constant 0 : index
    %10 = vector.load %arg2[%c0_3, %c0_4] : memref<256x512xi8, #tpu.memory_space<vmem>>, vector<256x512xi8>
    %11 = arith.sitofp %10 : vector<256x512xi8> to vector<256x512xbf16>
    %c0_5 = arith.constant 0 : index
    %c0_6 = arith.constant 0 : index
    %12 = vector.load %arg7[%c0_5, %c0_6] : memref<256x128xf32, #tpu.memory_space<vmem>>, vector<256x128xf32>
    %cst_7 = arith.constant dense<0.000000e+00> : vector<256x128xf32>
    %13 = tpu.matmul %11, %9, %cst_7 {dimension_numbers = #tpu.dot_dimension_numbers<[1], [0], [0], [1], [0, 0, 1, 1], [], []>} : vector<256x512xbf16>, vector<512x128xbf16>, vector<256x128xf32> -> vector<256x128xf32>
    %14 = arith.addf %12, %13 : vector<256x128xf32>
    %c0_8 = arith.constant 0 : index
    %c0_9 = arith.constant 0 : index
    %15 = vector.load %arg7[%c0_8, %c0_9] : memref<256x128xf32, #tpu.memory_space<vmem>>, vector<256x128xf32>
    tpu.vector_store %arg7[%c0_8, %c0_9], %14 {strides = array<i32>} : memref<256x128xf32, #tpu.memory_space<vmem>>, vector<256x128xf32>,
    %c0_i32_10 = arith.constant 0 : i32
    %16 = arith.cmpi eq, %arg1, %c0_i32_10 : i32
    %17 = arith.extui %16 : i1 to i32
    %c0_i32_11 = arith.constant 0 : i32
    %18 = arith.cmpi ne, %17, %c0_i32_11 : i32
    scf.if %18 {
      %c0_12 = arith.constant 0 : index
      %c0_13 = arith.constant 0 : index
      %19 = vector.load %arg7[%c0_12, %c0_13] : memref<256x128xf32, #tpu.memory_space<vmem>>, vector<256x128xf32>
      %c0_14 = arith.constant 0 : index
      %c0_15 = arith.constant 0 : index
      %20 = vector.load %arg5[%c0_14, %c0_15] : memref<256x1xf32, #tpu.memory_space<vmem>>, vector<256x1xf32>
      %21 = vector.broadcast %20 : vector<256x1xf32> to vector<256x128xf32>
      %22 = arith.mulf %19, %21 : vector<256x128xf32>
      %c0_16 = arith.constant 0 : index
      %c0_17 = arith.constant 0 : index
      %23 = vector.load %arg6[%c0_16, %c0_17] : memref<1x128xf32, #tpu.memory_space<vmem>>, vector<1x128xf32>
      %24 = vector.broadcast %23 : vector<1x128xf32> to vector<256x128xf32>
      %25 = arith.addf %22, %24 : vector<256x128xf32>
      %cst_18 = arith.constant 0.000000e+00 : f32
      %26 = vector.broadcast %cst_18 : f32 to vector<256x128xf32>
      %27 = arith.maximumf %25, %26 : vector<256x128xf32>
      %c0_19 = arith.constant 0 : index
      %c0_20 = arith.constant 0 : index
      %28 = vector.load %arg7[%c0_19, %c0_20] : memref<256x128xf32, #tpu.memory_space<vmem>>, vector<256x128xf32>
      tpu.vector_store %arg7[%c0_19, %c0_20], %27 {strides = array<i32>} : memref<256x128xf32, #tpu.memory_space<vmem>>, vector<256x128xf32>,
    } else {
    }
    return
  }
  func.func @transform_0(%arg0: i32, %arg1: i32) -> (i32, i32) {
    %c0_i32 = arith.constant 0 : i32
    return %arg0, %arg1 : i32, i32
  }
  func.func @transform_1(%arg0: i32, %arg1: i32) -> (i32, i32) {
    %c0_i32 = arith.constant 0 : i32
    %c0_i32_0 = arith.constant 0 : i32
    %c0_i32_1 = arith.constant 0 : i32
    return %c0_i32, %c0_i32_0 : i32, i32
  }
  func.func @transform_2(%arg0: i32, %arg1: i32) -> (i32, i32) {
    %c0_i32 = arith.constant 0 : i32
    %c0_i32_0 = arith.constant 0 : i32
    %c0_i32_1 = arith.constant 0 : i32
    return %c0_i32, %c0_i32_0 : i32, i32
  }
  func.func @transform_3(%arg0: i32, %arg1: i32) -> (i32, i32) {
    %c0_i32 = arith.constant 0 : i32
    %c0_i32_0 = arith.constant 0 : i32
    return %arg0, %c0_i32 : i32, i32
  }
  func.func @transform_4(%arg0: i32, %arg1: i32) -> (i32, i32) {
    %c0_i32 = arith.constant 0 : i32
    %c0_i32_0 = arith.constant 0 : i32
    %c0_i32_1 = arith.constant 0 : i32
    return %c0_i32, %c0_i32_0 : i32, i32
  }
  func.func @transform_5(%arg0: i32, %arg1: i32) -> (i32, i32) {
    %c0_i32 = arith.constant 0 : i32
    %c0_i32_0 = arith.constant 0 : i32
    return %arg0, %c0_i32 : i32, i32
  }
}

</mosaic_0001>

<bundles_post_ra>
// kernel: gcn_emb.3
= control target key start
LH: loop header
LB: loop body
LE: loop exit
PB: predicated region body
PF: predicated region fallthrough
CT: control target
= control target key end

     0   :  { %s2432_s18 = smov 0   ;;  %s2434_s19 = smov 0   ;;  %s2914_s0 = inlined_call_operand.vmem [shape: s8[512,512], index: 0, kind: input, shape index: {}]   ;;  %s2915_s1 = inlined_call_operand.vmem [shape: bf16[512,128], index: 1, kind: input, shape index: {}]   ;;  %s2916_s2 = inlined_call_operand.vmem [shape: bf16[128,128], index: 2, kind: input, shape index: {}]   ;;  %s2917_s3 = inlined_call_operand.vmem [shape: f32[512,1], index: 3, kind: input, shape index: {}]   ;;  %s2918_s4 = inlined_call_operand.vmem [shape: f32[1,128], index: 4, kind: input, shape index: {}]   ;;  %s2919_s5 = inlined_call_operand.vmem [shape: f32[512,128], index: 5, kind: output, shape index: {}]  }
   0x1   :  { %s2436_s20 = smov 0  }
   0x2 LB: > { %s27_s21 = sadd.s32 1, %s2395_s19  ;;  %p1897_p0 = scmp.ge.s32.totalorder %s2399_s20, 1  ;;  %s2399_s20 = sphi %s2436_s20, %s15_s20   ;;  %s2395_s19 = sphi %s2434_s19, %s2963_s19   ;;  %s2391_s18 = sphi %s2432_s18, %s2962_s18  }
   0x3   : > { %p29_p1 = scmp.ge.s32.totalorder %s27_s21, 2  ;;  %p219_p2 = scmp.lt.s32.totalorder %s2399_s20, 3 }
   0x5   : > { %s2965_s21 = smov (%p29_p1, %s27_s21), 0  ;;  %p220_p3 = pnand %p1897_p0, %p219_p2 }
   0x7   : > { %223 = sbr.rel (%p220_p3) target bundleno = 660 (0x294), region = 40 }
   0xc   : > { %v2337_v0 = vld [vmem:[%s2916_s2 + $0x38] sm:$0xff]   ;;  %v2338_v1 = vld [vmem:[%s2916_s2 + $0x30] sm:$0xff]   ;;  %v2339_v2 = vld [vmem:[%s2916_s2 + $0x28] sm:$0xff]   ;;  %s1898_s14 = sshll.u32 %s2391_s18, 3  ;;  %s1901_s23 = sshll.u32 %s2391_s18, 5 }
   0xd   : > { %2213 = vmatprep.subr.bf16.mxu0 %v2337_v0  ;;  %2293 = vmatprep.subr.bf16.mxu1 %v2337_v0  ;;  %v2340_v3 = vld [vmem:[%s2916_s2 + $0x20] sm:$0xff]   ;;  %v2341_v6 = vld [vmem:[%s2916_s2 + $0x18] sm:$0xff]   ;;  %v2342_v7 = vld [vmem:[%s2916_s2 + $0x10] sm:$0xff]   ;;  %p259_p4 = scmp.lt.s32.totalorder %s1898_s14, 15  ;;  %p270_p5 = scmp.lt.s32.totalorder %s1901_s23, 63 }
   0xe   : > { %2214 = vmatpush3.bf16.msra.mxu0 %v2337_v0  ;;  %2301 = vmatpush3.bf16.msra.mxu1 %v2337_v0  ;;  %v2345_v4 = vld [vmem:[%s2915_s1] sm:$0xff]   ;;  %v2343_v8 = vld [vmem:[%s2916_s2 + $0x8] sm:$0xff]   ;;  %v2349_v12 = vld [vmem:[%s2915_s1 + $0x10] sm:$0xff]  }
   0xf   : > { %2215 = vmatprep.subr.bf16.mxu0 %v2338_v1  ;;  %2294 = vmatprep.subr.bf16.mxu1 %v2338_v1  ;;  %v2346_v5 = vld [vmem:[%s2915_s1 + $0x80] sm:$0xff]   ;;  %v2347_v10 = vld [vmem:[%s2915_s1 + $0x8] sm:$0xff]   ;;  %v2350_v13 = vld [vmem:[%s2915_s1 + $0x90] sm:$0xff]   ;;  %s2967_s14 = smov (!%p259_p4, %s1898_s14), 15  ;;  %s2969_s23 = smov (!%p270_p5, %s1901_s23), 63 }
  0x10   : > { %2229 = vmatprep.mubr.bf16.mxu0 %v2345_v4  ;;  %2261 = vmatprep.mubr.bf16.mxu1 %v2346_v5  ;;  %v2344_v9 = vld [vmem:[%s2916_s2] sm:$0xff]   ;;  %v2348_v11 = vld [vmem:[%s2915_s1 + $0x88] sm:$0xff]   ;;  %v2351_v14 = vld [vmem:[%s2915_s1 + $0x18] sm:$0xff]   ;;  %s1948_s15 = sshll.u32 %s2967_s14, 5  ;;  %s1902_s24 = sshll.u32 %s2969_s23, 3 }
  0x11   : > { %v2352_v15 = vld [vmem:[%s2915_s1 + $0x98] sm:$0xff]   ;;  %v2353_v16 = vld [vmem:[%s2915_s1 + $0x20] sm:$0xff]   ;;  %v2355_v18 = vld [vmem:[%s2915_s1 + $0x28] sm:$0xff]   ;;  %s2576_s22 = scalar_lea.vmem %s2914_s0, %s1948_s15  ;;  %s2699_s26 = scalar_lea.vmem %s2917_s3, %s1902_s24 }
  0x12   : > { %2216 = vmatpush3.bf16.msra.mxu0 %v2338_v1  ;;  %2302 = vmatpush3.bf16.msra.mxu1 %v2338_v1  ;;  %v2354_v17 = vld [vmem:[%s2915_s1 + $0xa0] sm:$0xff]   ;;  %v2356_v19 = vld [vmem:[%s2915_s1 + $0xa8] sm:$0xff]   ;;  %v2357_v20 = vld [vmem:[%s2915_s1 + $0x30] sm:$0xff]   ;;  %s2839_s6 = scalar_lea.vmem %s2919_s5, %s1902_s24 }
  0x13   : > { %2217 = vmatprep.subr.bf16.mxu0 %v2339_v2  ;;  %2295 = vmatprep.subr.bf16.mxu1 %v2339_v2  ;;  %v2358_v21 = vld [vmem:[%s2915_s1 + $0xb0] sm:$0xff]   ;;  %v2359_v22 = vld [vmem:[%s2915_s1 + $0x38] sm:$0xff]   ;;  %v2361_v24 = vld [vmem:[%s2915_s1 + $0x40] sm:$0xff]  }
  0x14   : > { %v2360_v23 = vld [vmem:[%s2915_s1 + $0xb8] sm:$0xff]   ;;  %v2362_v25 = vld [vmem:[%s2915_s1 + $0xc0] sm:$0xff]   ;;  %v2363_v26 = vld [vmem:[%s2915_s1 + $0x48] sm:$0xff]  }
  0x15   : > { %v2364_v27 = vld [vmem:[%s2915_s1 + $0xc8] sm:$0xff]   ;;  %v2365_v28 = vld [vmem:[%s2915_s1 + $0x50] sm:$0xff]   ;;  %v2367_v30 = vld [vmem:[%s2915_s1 + $0x58] sm:$0xff]  }
  0x16   : > { %2218 = vmatpush3.bf16.msra.mxu0 %v2339_v2  ;;  %2303 = vmatpush3.bf16.msra.mxu1 %v2339_v2  ;;  %v2366_v29 = vld [vmem:[%s2915_s1 + $0xd0] sm:$0xff]   ;;  %v2368_v31 = vld [vmem:[%s2915_s1 + $0xd8] sm:$0xff]   ;;  %v2369_v32 = vld [vmem:[%s2915_s1 + $0x60] sm:$0xff]  }
  0x17   : > { %2219 = vmatprep.subr.bf16.mxu0 %v2340_v3  ;;  %2296 = vmatprep.subr.bf16.mxu1 %v2340_v3  ;;  %v2370_v33 = vld [vmem:[%s2915_s1 + $0xe0] sm:$0xff]   ;;  %v2371_v34 = vld [vmem:[%s2915_s1 + $0x68] sm:$0xff]   ;;  %v2373_v36 = vld [vmem:[%s2915_s1 + $0x70] sm:$0xff]  }
  0x18   : > { %v2372_v35 = vld [vmem:[%s2915_s1 + $0xe8] sm:$0xff]   ;;  %v2374_v37 = vld [vmem:[%s2915_s1 + $0xf0] sm:$0xff]   ;;  %v2375_v38 = vld [vmem:[%s2915_s1 + $0x78] sm:$0xff]  }
  0x19   : > { %v2376_v39 = vld [vmem:[%s2915_s1 + $0xf8] sm:$0xff]   ;;  %v2579_v40 = vld [vmem:[%s2576_s22 + $0x8] sm:$0xff]  ;;  %v1517_v63 = vld [vmem:[%s2699_s26 + $0x20] sm:$0xff] }
  0x1a   : > { %2220 = vmatpush3.bf16.msra.mxu0 %v2340_v3  ;;  %2304 = vmatpush3.bf16.msra.mxu1 %v2340_v3  ;;  %2930 = vst [vmem:[#allocation2_spill] sm:$0xff] %v2579_v40  ;;  %v2582_v41 = vld [vmem:[%s2576_s22 + $0x18] sm:$0xff]  ;;  %v997_v42 = vunpack.c.l.s8.bf16 %v2579_v40  ;;  %v1518_v2 = vld [vmem:[%s2699_s26 + $0x28] sm:$0xff] }
  0x1b   : > { %2221 = vmatprep.subr.bf16.mxu0 %v2341_v6  ;;  %2297 = vmatprep.subr.bf16.mxu1 %v2341_v6  ;;  %2931 = vst [vmem:[#allocation3_spill] sm:$0xff] %v2582_v41  ;;  %v999_v43 = vunpack.c.l.s8.bf16 %v2582_v41  ;;  %v1516_v54 = vld [vmem:[%s2699_s26 + $0x18] sm:$0xff] }
  0x1e   : > { %2222 = vmatpush3.bf16.msra.mxu0 %v2341_v6  ;;  %2305 = vmatpush3.bf16.msra.mxu1 %v2341_v6 }
  0x1f   : > { %2223 = vmatprep.subr.bf16.mxu0 %v2342_v7  ;;  %2298 = vmatprep.subr.bf16.mxu1 %v2342_v7 }
  0x22   : > { %2224 = vmatpush3.bf16.msra.mxu0 %v2342_v7  ;;  %2306 = vmatpush3.bf16.msra.mxu1 %v2342_v7 }
  0x23   : > { %2225 = vmatprep.subr.bf16.mxu0 %v2343_v8  ;;  %2299 = vmatprep.subr.bf16.mxu1 %v2343_v8 }
  0x26   : > { %2226 = vmatpush3.bf16.msra.mxu0 %v2343_v8  ;;  %2307 = vmatpush3.bf16.msra.mxu1 %v2343_v8 }
  0x27   : > { %2227 = vmatprep.subr.bf16.mxu0 %v2344_v9  ;;  %2300 = vmatprep.subr.bf16.mxu1 %v2344_v9 }
  0x2a   : > { %2228 = vmatpush3.bf16.msra.mxu0 %v2344_v9  ;;  %2308 = vmatpush3.bf16.msra.mxu1 %v2344_v9 }
  0x2d   : > { %2230 = vmatmul.mubr.bf16.vlgmr.msra.gmra.mxu0 %v2347_v10  ;;  %2262 = vmatmul.mubr.bf16.vlgmr.msra.gmra.mxu1 %v2348_v11 }
  0x2e   : > { %2233 = vmatprep.mubr.bf16.mxu0 %v2349_v12  ;;  %2265 = vmatprep.mubr.bf16.mxu1 %v2350_v13 }
  0x35   : > { %2234 = vmatmul.mubr.bf16.gmra.mxu0 %v2351_v14  ;;  %2266 = vmatmul.mubr.bf16.gmra.mxu1 %v2352_v15 }
  0x36   : > { %2237 = vmatprep.mubr.bf16.mxu0 %v2353_v16  ;;  %2269 = vmatprep.mubr.bf16.mxu1 %v2354_v17 }
  0x3d   : > { %2238 = vmatmul.mubr.bf16.gmra.mxu0 %v2355_v18  ;;  %2270 = vmatmul.mubr.bf16.gmra.mxu1 %v2356_v19 }
  0x3e   : > { %2241 = vmatprep.mubr.bf16.mxu0 %v2357_v20  ;;  %2273 = vmatprep.mubr.bf16.mxu1 %v2358_v21 }
  0x45   : > { %2242 = vmatmul.mubr.bf16.gmra.mxu0 %v2359_v22  ;;  %2274 = vmatmul.mubr.bf16.gmra.mxu1 %v2360_v23 }
  0x46   : > { %2245 = vmatprep.mubr.bf16.mxu0 %v2361_v24  ;;  %2277 = vmatprep.mubr.bf16.mxu1 %v2362_v25 }
  0x4d   : > { %2246 = vmatmul.mubr.bf16.gmra.mxu0 %v2363_v26  ;;  %2278 = vmatmul.mubr.bf16.gmra.mxu1 %v2364_v27 }
  0x4e   : > { %2249 = vmatprep.mubr.bf16.mxu0 %v2365_v28  ;;  %2281 = vmatprep.mubr.bf16.mxu1 %v2366_v29 }
  0x55   : > { %2250 = vmatmul.mubr.bf16.gmra.mxu0 %v2367_v30  ;;  %2282 = vmatmul.mubr.bf16.gmra.mxu1 %v2368_v31 }
  0x56   : > { %2253 = vmatprep.mubr.bf16.mxu0 %v2369_v32  ;;  %2285 = vmatprep.mubr.bf16.mxu1 %v2370_v33  ;;  %v2401_v32 = vmov 0   ;;  %v1513_v33 = vld [vmem:[%s2699_s26] sm:$0xff] }
  0x57   : > { %2335 = vset.pattern.permute.xlu0 %v2401_v32  ;;  %2336 = vset.pattern.permute.xlu1 %v2401_v32 }
  0x58   : > { %1547 = vperm.xlu0 %2335, %v1513_v33  }
  0x5d   : > { %2254 = vmatmul.mubr.bf16.gmra.mxu0 %v2371_v34  ;;  %2286 = vmatmul.mubr.bf16.gmra.mxu1 %v2372_v35 }
  0x5e   : > { %2257 = vmatprep.mubr.bf16.mxu0 %v2373_v36  ;;  %2289 = vmatprep.mubr.bf16.mxu1 %v2374_v37 }
  0x65   : > { %2258 = vmatmul.mubr.bf16.gmra.mxu0 %v2375_v38  ;;  %2290 = vmatmul.mubr.bf16.gmra.mxu1 %v2376_v39  ;;  %v1514_v38 = vld [vmem:[%s2699_s26 + $0x8] sm:$0xff]  ;;  %v1515_v39 = vld [vmem:[%s2699_s26 + $0x10] sm:$0xff] }
  0x66   : > { %1124 = vmatprep.mubr.bf16.mxu1 %v997_v42  ;;  %1285 = vmatprep.mubr.bf16.mxu0 %v999_v43 }
  0x67   : > { %1552 = vperm.xlu0 %2335, %v1514_v38   ;;  %1557 = vperm.xlu1 %2336, %v1515_v39   ;;  %v1520_v38 = vld [vmem:[%s2699_s26 + $0x38] sm:$0xff]  ;;  %v1519_v39 = vld [vmem:[%s2699_s26 + $0x30] sm:$0xff] }
  0x6b   : > { %1562 = vperm.xlu1 %2336, %v1516_v54   ;;  %1567 = vperm.xlu0 %2335, %v1517_v63  }
  0x6f   : > { %1572 = vperm.xlu1 %2336, %v1518_v2   ;;  %1577 = vperm.xlu0 %2335, %v1519_v39   ;;  %v969_v39 = vld [vmem:[%s2576_s22 + $0x28] sm:$0xff] }
  0x73   : > { %1582 = vperm.xlu1 %2336, %v1520_v38   ;;  %v1537_v38 = vld [vmem:[%s2699_s26 + $0xc0] sm:$0xff] }
  0xed   : > { %v2586_v44 = vpop.f32.mrf.mxu0  ;;  %v2588_v45 = vpop.f32.mrf.mxu1 }
  0xee   : > { %2932 = vst [vmem:[#allocation4_spill] sm:$0xff] %v2586_v44  ;;  %2933 = vst [vmem:[#allocation5_spill] sm:$0xff] %v2588_v45 }
  0xef   : > { %v2590_v46 = vpop.f32.mrf.mxu0  ;;  %v2592_v47 = vpop.f32.mrf.mxu1 }
  0xf0   : > { %2934 = vst [vmem:[#allocation6_spill] sm:$0xff] %v2590_v46  ;;  %2935 = vst [vmem:[#allocation7_spill] sm:$0xff] %v2592_v47 }
  0xf1   : > { %v2594_v48 = vpop.f32.mrf.mxu0  ;;  %v2596_v49 = vpop.f32.mrf.mxu1 }
  0xf2   : > { %2936 = vst [vmem:[#allocation8_spill] sm:$0xff] %v2594_v48  ;;  %2937 = vst [vmem:[#allocation9_spill] sm:$0xff] %v2596_v49 }
  0xf3   : > { %v2602_v52 = vpop.f32.mrf.mxu0  ;;  %v2604_v53 = vpop.f32.mrf.mxu1 }
  0xf4   : > { %2938 = vst [vmem:[#allocation10_spill] sm:$0xff] %v2602_v52  ;;  %2939 = vst [vmem:[#allocation11_spill] sm:$0xff] %v2604_v53 }
  0xf5   : > { %v2610_v56 = vpop.f32.mrf.mxu0  ;;  %v2612_v57 = vpop.f32.mrf.mxu1 }
  0xf7   : > { %v2614_v58 = vpop.f32.mrf.mxu0  ;;  %v2616_v59 = vpop.f32.mrf.mxu1 }
  0xf9   : > { %v2618_v60 = vpop.f32.mrf.mxu0  ;;  %v2620_v61 = vpop.f32.mrf.mxu1 }
  0xfb   : > { %v2626_v0 = vpop.f32.mrf.mxu0  ;;  %v2628_v1 = vpop.f32.mrf.mxu1 }
  0xfd   : > { %v2634_v4 = vpop.f32.mrf.mxu0  ;;  %v2636_v5 = vpop.f32.mrf.mxu1 }
  0xff   : > { %v2638_v6 = vpop.f32.mrf.mxu0  ;;  %v2640_v7 = vpop.f32.mrf.mxu1 }
 0x101   : > { %v2642_v8 = vpop.f32.mrf.mxu0  ;;  %v2644_v9 = vpop.f32.mrf.mxu1 }
 0x103   : > { %v2646_v10 = vpop.f32.mrf.mxu0  ;;  %v2648_v11 = vpop.f32.mrf.mxu1 }
 0x105   : > { %v2650_v12 = vpop.f32.mrf.mxu0  ;;  %v2652_v13 = vpop.f32.mrf.mxu1 }
 0x107   : > { %v2654_v14 = vpop.f32.mrf.mxu0  ;;  %v2656_v15 = vpop.f32.mrf.mxu1 }
 0x109   : > { %v2658_v16 = vpop.f32.mrf.mxu0  ;;  %v2660_v17 = vpop.f32.mrf.mxu1 }
 0x10a   : > { %v939_v45 = vpack.c.bf16 %v2658_v16, %v2650_v12  ;;  %v955_v49 = vpack.c.bf16 %v2660_v17, %v2652_v13  ;;  %v2943_v12 = vpack.c.bf16 %v2620_v61, %v2612_v57  ;;  %v2944_v57 = vpack.c.bf16 %v2626_v0, %v2614_v58  ;;  %v2948_v58 = vld [vmem:[#allocation8_spill] sm:$0xff] }
 0x10b   : > { %v2662_v18 = vpop.f32.mrf.mxu0  ;;  %v2664_v19 = vpop.f32.mrf.mxu1  ;;  %v2945_v61 = vpack.c.bf16 %v2628_v1, %v2616_v59  ;;  %v2949_v0 = vld [vmem:[#allocation4_spill] sm:$0xff]  ;;  %v2951_v59 = vld [vmem:[#allocation9_spill] sm:$0xff] }
 0x10c   : > { %v2952_v1 = vld [vmem:[#allocation5_spill] sm:$0xff] }
 0x10d   : > { %v2666_v20 = vpop.f32.mrf.mxu0  ;;  %v2668_v21 = vpop.f32.mrf.mxu1 }
 0x10f   : > { %v2670_v22 = vpop.f32.mrf.mxu0  ;;  %v2672_v23 = vpop.f32.mrf.mxu1 }
 0x110   : > { %2940 = vst [vmem:[#allocation12_spill] sm:$0xff] %v2672_v23  ;;  %v1521_v23 = vld [vmem:[%s2699_s26 + $0x40] sm:$0xff] }
 0x111   : > { %v2674_v24 = vpop.f32.mrf.mxu0  ;;  %v2676_v25 = vpop.f32.mrf.mxu1  ;;  %1587 = vperm.xlu0 %2335, %v1521_v23   ;;  %v2953_v23 = vpack.c.bf16 %v2951_v59, %v2952_v1  ;;  %v983_v59 = vld [vmem:[%s2576_s22 + $0x98] sm:$0xff] }
 0x112   : > { %v941_v13 = vpack.c.bf16 %v2674_v24, %v2666_v20  ;;  %v1533_v20 = vld [vmem:[%s2699_s26 + $0xa0] sm:$0xff] }
 0x113   : > { %v2679_v26 = vpop.f32.mrf.mxu0  ;;  %v2681_v27 = vpop.f32.mrf.mxu1  ;;  %v964_v24 = vld [vmem:[%s2576_s22] sm:$0xff] }
 0x114   : > { %2941 = vst [vmem:[#allocation13_spill] sm:$0xff] %v2681_v27  ;;  %v1522_v27 = vld [vmem:[%s2699_s26 + $0x48] sm:$0xff] }
 0x115   : > { %v2685_v28 = vpop.f32.mrf.mxu0  ;;  %v2687_v29 = vpop.f32.mrf.mxu1  ;;  %1592 = vperm.xlu1 %2336, %v1522_v27   ;;  %v1536_v27 = vld [vmem:[%s2699_s26 + $0xb8] sm:$0xff] }
 0x117   : > { %v2690_v30 = vpop.f32.mrf.mxu0  ;;  %v2692_v31 = vpop.f32.mrf.mxu1  ;;  %v2946_v16 = vld [vmem:[#allocation12_spill] sm:$0xff] }
 0x119   : > { %v2702_v34 = vpop.f32.mrf.mxu0  ;;  %v2704_v35 = vpop.f32.mrf.mxu1 }
 0x11b   : > { %v2706_v36 = vpop.f32.mrf.mxu0  ;;  %v2708_v37 = vpop.f32.mrf.mxu1  ;;  %v2947_v17 = vld [vmem:[#allocation13_spill] sm:$0xff] }
 0x11d   : > { %v2255_v42 = vpop.f32.mrf.mxu0  ;;  %v2287_v43 = vpop.f32.mrf.mxu1 }
 0x11f   : > { %v773_v55 = vpop.f32.mrf.mxu0  ;;  %v901_v32 = vpop.f32.mrf.mxu1 }
 0x121   : > { %v2256_v51 = vpop.f32.mrf.mxu0  ;;  %v2288_v50 = vpop.f32.mrf.mxu1 }
 0x123   : > { %v776_v33 = vpop.f32.mrf.mxu0  ;;  %v904_v3 = vpop.f32.mrf.mxu1 }
 0x125   : > { %v2259_v62 = vpop.f32.mrf.mxu0  ;;  %v2291_v41 = vpop.f32.mrf.mxu1 }
 0x127   : > { %v789_v40 = vpop.f32.mrf.mxu0  ;;  %v917_v47 = vpop.f32.mrf.mxu1 }
 0x129   : > { %v2260_v53 = vpop.f32.mrf.mxu0  ;;  %v2292_v46 = vpop.f32.mrf.mxu1 }
 0x12a   : > { %v947_v52 = vpack.c.bf16 %v2260_v53, %v2259_v62  ;;  %v963_v54 = vpack.c.bf16 %v2292_v46, %v2291_v41  ;;  %v938_v41 = vpack.c.bf16 %v2662_v18, %v2654_v14  ;;  %v954_v46 = vpack.c.bf16 %v2664_v19, %v2656_v15  ;;  %v1523_v53 = vld [vmem:[%s2699_s26 + $0x50] sm:$0xff]  ;;  %v1534_v19 = vld [vmem:[%s2699_s26 + $0xa8] sm:$0xff] }
 0x12b   : > { %v792_v2 = vpop.f32.mrf.mxu0  ;;  %v920_v63 = vpop.f32.mrf.mxu1  ;;  %1597 = vperm.xlu0 %2335, %v1523_v53   ;;  %v936_v62 = vpack.c.bf16 %v2646_v10, %v2638_v6  ;;  %v942_v6 = vpack.c.bf16 %v2706_v36, %v2690_v30  ;;  %v1529_v10 = vld [vmem:[%s2699_s26 + $0x80] sm:$0xff]  ;;  %v957_v14 = vpack.c.bf16 %v2676_v25, %v2668_v21  ;;  %v940_v15 = vpack.c.bf16 %v2679_v26, %v2670_v22  ;;  %v966_v25 = vld [vmem:[%s2576_s22 + $0x10] sm:$0xff] }
 0x12c   : > { %v946_v44 = vpack.c.bf16 %v792_v2, %v789_v40  ;;  %v962_v48 = vpack.c.bf16 %v920_v63, %v917_v47  ;;  %1989 = vmatprep.subr.bf16.mxu1 %v947_v52  ;;  %2101 = vmatprep.subr.bf16.mxu0 %v963_v54  ;;  %v945_v40 = vpack.c.bf16 %v2256_v51, %v2255_v42  ;;  %v1524_v52 = vld [vmem:[%s2699_s26 + $0x58] sm:$0xff]  ;;  %v1526_v51 = vld [vmem:[%s2699_s26 + $0x68] sm:$0xff]  ;;  %v996_v22 = vunpack.c.l.s8.bf16 %v964_v24  ;;  %v2955_v30 = vld [vmem:[#allocation6_spill] sm:$0xff] }
 0x12d   : > { %1990 = vmatpush3.bf16.msra.mxu1 %v939_v45  ;;  %2102 = vmatpush3.bf16.msra.mxu0 %v955_v49  ;;  %v961_v47 = vpack.c.bf16 %v2288_v50, %v2287_v43  ;;  %v953_v45 = vpack.c.bf16 %v2644_v9, %v2636_v5  ;;  %v960_v49 = vpack.c.bf16 %v904_v3, %v901_v32  ;;  %v1525_v50 = vld [vmem:[%s2699_s26 + $0x60] sm:$0xff]  ;;  %v1528_v5 = vld [vmem:[%s2699_s26 + $0x78] sm:$0xff]  ;;  %v1530_v9 = vld [vmem:[%s2699_s26 + $0x88] sm:$0xff]  ;;  %v998_v26 = vunpack.c.l.s8.bf16 %v966_v25 }
 0x12e   : > { %1991 = vmatprep.subr.bf16.mxu1 %v946_v44  ;;  %2103 = vmatprep.subr.bf16.mxu0 %v962_v48  ;;  %v937_v44 = vpack.c.bf16 %v2642_v8, %v2634_v4  ;;  %v944_v48 = vpack.c.bf16 %v776_v33, %v773_v55  ;;  %v952_v4 = vpack.c.bf16 %v2648_v11, %v2640_v7  ;;  %v1527_v8 = vld [vmem:[%s2699_s26 + $0x70] sm:$0xff]  ;;  %v2961_v43 = vld [vmem:[#allocation3_spill] sm:$0xff]  ;;  %v971_v54 = vld [vmem:[%s2576_s22 + $0x38] sm:$0xff]  ;;  %v1000_v2 = vunpack.c.h.s8.bf16 %v964_v24 }
 0x12f   : > { %1602 = vperm.xlu1 %2336, %v1524_v52   ;;  %1607 = vperm.xlu0 %2335, %v1525_v50   ;;  %v943_v55 = vpack.c.bf16 %v2702_v34, %v2685_v28  ;;  %v959_v3 = vpack.c.bf16 %v2704_v35, %v2687_v29  ;;  %v958_v7 = vpack.c.bf16 %v2708_v37, %v2692_v31  ;;  %v1535_v28 = vld [vmem:[%s2699_s26 + $0xb0] sm:$0xff]  ;;  %v2954_v29 = vld [vmem:[#allocation10_spill] sm:$0xff]  ;;  %v2957_v34 = vld [vmem:[#allocation11_spill] sm:$0xff]  ;;  %v1003_v32 = vunpack.c.h.s8.bf16 %v2961_v43 }
 0x130   : > { %v2942_v11 = vpack.c.bf16 %v2618_v60, %v2610_v56  ;;  %v1532_v56 = vld [vmem:[%s2699_s26 + $0x98] sm:$0xff]  ;;  %v1531_v60 = vld [vmem:[%s2699_s26 + $0x90] sm:$0xff]  ;;  %v956_v18 = vpack.c.bf16 %v2947_v17, %v2946_v16  ;;  %v2950_v21 = vpack.c.bf16 %v2948_v58, %v2949_v0  ;;  %v2956_v31 = vpack.c.bf16 %v2954_v29, %v2955_v30  ;;  %v2958_v35 = vld [vmem:[#allocation7_spill] sm:$0xff] }
 0x131   : > { %1992 = vmatpush3.bf16.msra.mxu1 %v938_v41  ;;  %2104 = vmatpush3.bf16.msra.mxu0 %v954_v46  ;;  %v2959_v36 = vpack.c.bf16 %v2957_v34, %v2958_v35  ;;  %v2960_v37 = vld [vmem:[#allocation2_spill] sm:$0xff]  ;;  %v1538_v33 = vld [vmem:[%s2699_s26 + $0xc8] sm:$0xff]  ;;  %v1002_v63 = vunpack.c.h.s8.bf16 %v966_v25  ;;  %v1540_v41 = vld [vmem:[%s2699_s26 + $0xd8] sm:$0xff]  ;;  %v1031_v25 = vunpack.c.l.s8.bf16 %v983_v59  ;;  %v1035_v30 = vunpack.c.h.s8.bf16 %v983_v59 }
 0x132   : > { %1993 = vmatprep.subr.bf16.mxu1 %v945_v40  ;;  %2105 = vmatprep.subr.bf16.mxu0 %v961_v47  ;;  %v1001_v42 = vunpack.c.h.s8.bf16 %v2960_v37  ;;  %v1539_v46 = vld [vmem:[%s2699_s26 + $0xd0] sm:$0xff]  ;;  %v1005_v40 = vunpack.c.l.s8.bf16 %v969_v39  ;;  %v1007_v47 = vunpack.c.l.s8.bf16 %v971_v54  ;;  %v1542_v52 = vld [vmem:[%s2699_s26 + $0xe8] sm:$0xff]  ;;  %v1541_v53 = vld [vmem:[%s2699_s26 + $0xe0] sm:$0xff] }
 0x133   : > { %1612 = vperm.xlu1 %2336, %v1526_v51   ;;  %1617 = vperm.xlu0 %2335, %v1527_v8   ;;  %v1544_v51 = vld [vmem:[%s2699_s26 + $0xf8] sm:$0xff]  ;;  %v1543_v50 = vld [vmem:[%s2699_s26 + $0xf0] sm:$0xff]  ;;  %v976_v17 = vld [vmem:[%s2576_s22 + $0x60] sm:$0xff] }
 0x134   : > { %v1024_v1 = vunpack.c.h.s8.bf16 %v976_v17  ;;  %v987_v34 = vld [vmem:[%s2576_s22 + $0xb8] sm:$0xff]  ;;  %v984_v43 = vld [vmem:[%s2576_s22 + $0xa0] sm:$0xff] }
 0x135   : > { %1994 = vmatpush3.bf16.msra.mxu1 %v937_v44  ;;  %2106 = vmatpush3.bf16.msra.mxu0 %v953_v45  ;;  %v968_v44 = vld [vmem:[%s2576_s22 + $0x20] sm:$0xff]  ;;  %v970_v45 = vld [vmem:[%s2576_s22 + $0x30] sm:$0xff] }
 0x136   : > { %1995 = vmatprep.subr.bf16.mxu1 %v944_v48  ;;  %2107 = vmatprep.subr.bf16.mxu0 %v960_v49  ;;  %v1004_v48 = vunpack.c.l.s8.bf16 %v968_v44  ;;  %v1006_v49 = vunpack.c.l.s8.bf16 %v970_v45  ;;  %v1010_v8 = vunpack.c.h.s8.bf16 %v970_v45 }
 0x137   : > { %1622 = vperm.xlu1 %2336, %v1528_v5   ;;  %1627 = vperm.xlu0 %2335, %v1529_v10   ;;  %v1008_v5 = vunpack.c.h.s8.bf16 %v968_v44  ;;  %v974_v10 = vld [vmem:[%s2576_s22 + $0x50] sm:$0xff] }
 0x139   : > { %1996 = vmatpush3.bf16.msra.mxu1 %v936_v62  ;;  %2108 = vmatpush3.bf16.msra.mxu0 %v952_v4  ;;  %v1009_v62 = vunpack.c.h.s8.bf16 %v969_v39  ;;  %v1011_v4 = vunpack.c.h.s8.bf16 %v971_v54  ;;  %v1043_v54 = vunpack.c.h.s8.bf16 %v987_v34 }
 0x13a   : > { %1997 = vmatprep.subr.bf16.mxu1 %v943_v55  ;;  %2109 = vmatprep.subr.bf16.mxu0 %v959_v3  ;;  %v973_v55 = vld [vmem:[%s2576_s22 + $0x48] sm:$0xff]  ;;  %v975_v3 = vld [vmem:[%s2576_s22 + $0x58] sm:$0xff] }
 0x13b   : > { %1632 = vperm.xlu1 %2336, %v1530_v9   ;;  %1637 = vperm.xlu0 %2335, %v1531_v60   ;;  %v972_v9 = vld [vmem:[%s2576_s22 + $0x40] sm:$0xff]  ;;  %v979_v60 = vld [vmem:[%s2576_s22 + $0x78] sm:$0xff] }
 0x13c   : > { %v1023_v16 = vunpack.c.l.s8.bf16 %v979_v60  ;;  %v1027_v0 = vunpack.c.h.s8.bf16 %v979_v60 }
 0x13d   : > { %1998 = vmatpush3.bf16.msra.mxu1 %v2942_v11  ;;  %2110 = vmatpush3.bf16.msra.mxu0 %v2943_v12  ;;  %v1012_v11 = vunpack.c.l.s8.bf16 %v972_v9  ;;  %v1014_v12 = vunpack.c.l.s8.bf16 %v974_v10 }
 0x13e   : > { %1999 = vmatprep.subr.bf16.mxu1 %v942_v6  ;;  %2111 = vmatprep.subr.bf16.mxu0 %v958_v7  ;;  %v1013_v6 = vunpack.c.l.s8.bf16 %v973_v55  ;;  %v1015_v7 = vunpack.c.l.s8.bf16 %v975_v3 }
 0x13f   : > { %1642 = vperm.xlu1 %2336, %v1532_v56   ;;  %1647 = vperm.xlu0 %2335, %v1533_v20   ;;  %v977_v56 = vld [vmem:[%s2576_s22 + $0x68] sm:$0xff] }
 0x140   : > { %v1025_v58 = vunpack.c.h.s8.bf16 %v977_v56 }
 0x141   : > { %2000 = vmatpush3.bf16.msra.mxu1 %v2944_v57  ;;  %2112 = vmatpush3.bf16.msra.mxu0 %v2945_v61  ;;  %v1016_v57 = vunpack.c.h.s8.bf16 %v972_v9  ;;  %v1018_v61 = vunpack.c.h.s8.bf16 %v974_v10 }
 0x142   : > { %2001 = vmatprep.subr.bf16.mxu1 %v941_v13  ;;  %2113 = vmatprep.subr.bf16.mxu0 %v957_v14  ;;  %v1017_v13 = vunpack.c.h.s8.bf16 %v973_v55  ;;  %v1019_v14 = vunpack.c.h.s8.bf16 %v975_v3 }
 0x143   : > { %1652 = vperm.xlu1 %2336, %v1534_v19   ;;  %1657 = vperm.xlu0 %2335, %v1535_v28   ;;  %v1020_v19 = vunpack.c.l.s8.bf16 %v976_v17 }
 0x145   : > { %2002 = vmatpush3.bf16.msra.mxu1 %v2950_v21  ;;  %2114 = vmatpush3.bf16.msra.mxu0 %v2953_v23  ;;  %v981_v21 = vld [vmem:[%s2576_s22 + $0x88] sm:$0xff] }
 0x146   : > { %2003 = vmatprep.subr.bf16.mxu1 %v940_v15  ;;  %2115 = vmatprep.subr.bf16.mxu0 %v956_v18  ;;  %v1021_v15 = vunpack.c.l.s8.bf16 %v977_v56  ;;  %v978_v18 = vld [vmem:[%s2576_s22 + $0x70] sm:$0xff]  ;;  %v1029_v24 = vunpack.c.l.s8.bf16 %v981_v21  ;;  %v1033_v29 = vunpack.c.h.s8.bf16 %v981_v21 }
 0x147   : > { %1662 = vperm.xlu1 %2336, %v1536_v27   ;;  %1667 = vperm.xlu0 %2335, %v1537_v38   ;;  %v1022_v20 = vunpack.c.l.s8.bf16 %v978_v18  ;;  %v1026_v23 = vunpack.c.h.s8.bf16 %v978_v18 }
 0x149   : > { %2004 = vmatpush3.bf16.msra.mxu1 %v2956_v31  ;;  %2116 = vmatpush3.bf16.msra.mxu0 %v2959_v36  ;;  %v985_v31 = vld [vmem:[%s2576_s22 + $0xa8] sm:$0xff] }
 0x14a   : > { %v1037_v37 = vunpack.c.l.s8.bf16 %v985_v31  ;;  %v1041_v39 = vunpack.c.h.s8.bf16 %v985_v31 }
 0x14b   : > { %1672 = vperm.xlu1 %2336, %v1538_v33   ;;  %1677 = vperm.xlu0 %2335, %v1539_v46   ;;  %v1036_v33 = vunpack.c.l.s8.bf16 %v984_v43 }
 0x14c   : > { %1125 = vmatmul.mubr.bf16.vlgmr.msra.gmra.mxu1 %v996_v22  ;;  %1286 = vmatmul.mubr.bf16.vlgmr.msra.gmra.mxu0 %v998_v26  ;;  %v980_v22 = vld [vmem:[%s2576_s22 + $0x80] sm:$0xff]  ;;  %v982_v26 = vld [vmem:[%s2576_s22 + $0x90] sm:$0xff] }
 0x14d   : > { %1132 = vmatprep.mubr.bf16.mxu1 %v1001_v42  ;;  %1293 = vmatprep.mubr.bf16.mxu0 %v1003_v32  ;;  %v1028_v27 = vunpack.c.l.s8.bf16 %v980_v22  ;;  %v1030_v28 = vunpack.c.l.s8.bf16 %v982_v26  ;;  %v1032_v35 = vunpack.c.h.s8.bf16 %v980_v22  ;;  %v1034_v36 = vunpack.c.h.s8.bf16 %v982_v26  ;;  %v986_v32 = vld [vmem:[%s2576_s22 + $0xb0] sm:$0xff] }
 0x14e   : > { %v1039_v42 = vunpack.c.l.s8.bf16 %v987_v34  ;;  %v1038_v38 = vunpack.c.l.s8.bf16 %v986_v32  ;;  %v1042_v46 = vunpack.c.h.s8.bf16 %v986_v32 }
 0x14f   : > { %1682 = vperm.xlu1 %2336, %v1540_v41   ;;  %1687 = vperm.xlu0 %2335, %v1541_v53   ;;  %v1040_v41 = vunpack.c.h.s8.bf16 %v984_v43  ;;  %v990_v53 = vld [vmem:[%s2576_s22 + $0xd0] sm:$0xff] }
 0x150   : > { %v1046_v45 = vunpack.c.l.s8.bf16 %v990_v53 }
 0x153   : > { %1692 = vperm.xlu1 %2336, %v1542_v52   ;;  %1697 = vperm.xlu0 %2335, %v1543_v50   ;;  %v988_v52 = vld [vmem:[%s2576_s22 + $0xc0] sm:$0xff]  ;;  %v995_v50 = vld [vmem:[%s2576_s22 + $0xf8] sm:$0xff] }
 0x154   : > { %1133 = vmatmul.mubr.bf16.gmra.mxu1 %v1000_v2  ;;  %1294 = vmatmul.mubr.bf16.gmra.mxu0 %v1002_v63  ;;  %v989_v2 = vld [vmem:[%s2576_s22 + $0xc8] sm:$0xff]  ;;  %v991_v63 = vld [vmem:[%s2576_s22 + $0xd8] sm:$0xff]  ;;  %v1044_v44 = vunpack.c.l.s8.bf16 %v988_v52  ;;  %v1055_v3 = vunpack.c.l.s8.bf16 %v995_v50  ;;  %v1059_v10 = vunpack.c.h.s8.bf16 %v995_v50 }
 0x155   : > { %1140 = vmatprep.mubr.bf16.mxu1 %v1005_v40  ;;  %1301 = vmatprep.mubr.bf16.mxu0 %v1007_v47  ;;  %v1045_v40 = vunpack.c.l.s8.bf16 %v989_v2  ;;  %v1047_v47 = vunpack.c.l.s8.bf16 %v991_v63 }
 0x157   : > { %1702 = vperm.xlu1 %2336, %v1544_v51   ;;  %v993_v51 = vld [vmem:[%s2576_s22 + $0xe8] sm:$0xff] }
 0x158   : > { %v1053_v55 = vunpack.c.l.s8.bf16 %v993_v51  ;;  %v1057_v9 = vunpack.c.h.s8.bf16 %v993_v51 }
 0x15c   : > { %1141 = vmatmul.mubr.bf16.gmra.mxu1 %v1004_v48  ;;  %1302 = vmatmul.mubr.bf16.gmra.mxu0 %v1006_v49  ;;  %v1049_v48 = vunpack.c.h.s8.bf16 %v989_v2  ;;  %v1051_v49 = vunpack.c.h.s8.bf16 %v991_v63 }
 0x15d   : > { %1148 = vmatprep.mubr.bf16.mxu1 %v1009_v62  ;;  %1309 = vmatprep.mubr.bf16.mxu0 %v1011_v4  ;;  %v1048_v62 = vunpack.c.h.s8.bf16 %v988_v52  ;;  %v1050_v4 = vunpack.c.h.s8.bf16 %v990_v53 }
 0x164   : > { %1149 = vmatmul.mubr.bf16.gmra.mxu1 %v1008_v5  ;;  %1310 = vmatmul.mubr.bf16.gmra.mxu0 %v1010_v8  ;;  %v992_v5 = vld [vmem:[%s2576_s22 + $0xe0] sm:$0xff]  ;;  %v994_v8 = vld [vmem:[%s2576_s22 + $0xf0] sm:$0xff] }
 0x165   : > { %1156 = vmatprep.mubr.bf16.mxu1 %v1013_v6  ;;  %1317 = vmatprep.mubr.bf16.mxu0 %v1015_v7  ;;  %v1052_v6 = vunpack.c.l.s8.bf16 %v992_v5  ;;  %v1054_v7 = vunpack.c.l.s8.bf16 %v994_v8 }
 0x16c   : > { %1157 = vmatmul.mubr.bf16.gmra.mxu1 %v1012_v11  ;;  %1318 = vmatmul.mubr.bf16.gmra.mxu0 %v1014_v12  ;;  %v1056_v11 = vunpack.c.h.s8.bf16 %v992_v5  ;;  %v1058_v12 = vunpack.c.h.s8.bf16 %v994_v8 }
 0x16d   : > { %1164 = vmatprep.mubr.bf16.mxu1 %v1017_v13  ;;  %1325 = vmatprep.mubr.bf16.mxu0 %v1019_v14 }
 0x174   : > { %1165 = vmatmul.mubr.bf16.gmra.mxu1 %v1016_v57  ;;  %1326 = vmatmul.mubr.bf16.gmra.mxu0 %v1018_v61 }
 0x175   : > { %1172 = vmatprep.mubr.bf16.mxu1 %v1021_v15  ;;  %1333 = vmatprep.mubr.bf16.mxu0 %v1023_v16  ;;  %v1548_v15 = vpop.permute.xlu0 %1547 }
 0x17c   : > { %1173 = vmatmul.mubr.bf16.gmra.mxu1 %v1020_v19  ;;  %1334 = vmatmul.mubr.bf16.gmra.mxu0 %v1022_v20 }
 0x17d   : > { %1180 = vmatprep.mubr.bf16.mxu1 %v1025_v58  ;;  %1341 = vmatprep.mubr.bf16.mxu0 %v1027_v0 }
 0x184   : > { %1181 = vmatmul.mubr.bf16.gmra.mxu1 %v1024_v1  ;;  %1342 = vmatmul.mubr.bf16.gmra.mxu0 %v1026_v23  ;;  %v2832_v1 = vld [vmem:[%s2918_s4] ss:$0 sm:$0xff] }
 0x185   : > { %1188 = vmatprep.mubr.bf16.mxu1 %v1029_v24  ;;  %1349 = vmatprep.mubr.bf16.mxu0 %v1031_v25  ;;  %v1553_v25 = vpop.permute.xlu0 %1552 }
 0x18c   : > { %1189 = vmatmul.mubr.bf16.gmra.mxu1 %v1028_v27  ;;  %1350 = vmatmul.mubr.bf16.gmra.mxu0 %v1030_v28 }
 0x18d   : > { %1196 = vmatprep.mubr.bf16.mxu1 %v1033_v29  ;;  %1357 = vmatprep.mubr.bf16.mxu0 %v1035_v30 }
 0x194   : > { %1197 = vmatmul.mubr.bf16.gmra.mxu1 %v1032_v35  ;;  %1358 = vmatmul.mubr.bf16.gmra.mxu0 %v1034_v36  ;;  %v1558_v36 = vpop.permute.xlu1 %1557 }
 0x195   : > { %1204 = vmatprep.mubr.bf16.mxu1 %v1037_v37  ;;  %1365 = vmatprep.mubr.bf16.mxu0 %v1039_v42 }
 0x198   : > { %v1563_v52 = vpop.permute.xlu1 %1562 }
 0x19c   : > { %1205 = vmatmul.mubr.bf16.gmra.mxu1 %v1036_v33  ;;  %1366 = vmatmul.mubr.bf16.gmra.mxu0 %v1038_v38 }
 0x19d   : > { %1212 = vmatprep.mubr.bf16.mxu1 %v1041_v39  ;;  %1373 = vmatprep.mubr.bf16.mxu0 %v1043_v54 }
 0x1a4   : > { %1213 = vmatmul.mubr.bf16.gmra.mxu1 %v1040_v41  ;;  %1374 = vmatmul.mubr.bf16.gmra.mxu0 %v1042_v46 }
 0x1a5   : > { %1220 = vmatprep.mubr.bf16.mxu1 %v1045_v40  ;;  %1381 = vmatprep.mubr.bf16.mxu0 %v1047_v47 }
 0x1ac   : > { %1221 = vmatmul.mubr.bf16.gmra.mxu1 %v1044_v44  ;;  %1382 = vmatmul.mubr.bf16.gmra.mxu0 %v1046_v45 }
 0x1ad   : > { %1228 = vmatprep.mubr.bf16.mxu1 %v1049_v48  ;;  %1389 = vmatprep.mubr.bf16.mxu0 %v1051_v49 }
 0x1b4   : > { %1229 = vmatmul.mubr.bf16.gmra.mxu1 %v1048_v62  ;;  %1390 = vmatmul.mubr.bf16.gmra.mxu0 %v1050_v4 }
 0x1b5   : > { %1236 = vmatprep.mubr.bf16.mxu1 %v1053_v55  ;;  %1397 = vmatprep.mubr.bf16.mxu0 %v1055_v3  ;;  %v1568_v55 = vpop.permute.xlu0 %1567 }
 0x1bc   : > { %1237 = vmatmul.mubr.bf16.gmra.mxu1 %v1052_v6  ;;  %1398 = vmatmul.mubr.bf16.gmra.mxu0 %v1054_v7 }
 0x1bd   : > { %1244 = vmatprep.mubr.bf16.mxu1 %v1057_v9  ;;  %1405 = vmatprep.mubr.bf16.mxu0 %v1059_v10 }
 0x1c4   : > { %1245 = vmatmul.mubr.bf16.gmra.mxu1 %v1056_v11  ;;  %1406 = vmatmul.mubr.bf16.gmra.mxu0 %v1058_v12  ;;  %v1573_v12 = vpop.permute.xlu1 %1572 }
 0x20c   : > { %v2005_v13 = vpop.f32.mrf.mxu1  ;;  %v2117_v14 = vpop.f32.mrf.mxu0 }
 0x20e   : > { %v2006_v56 = vpop.f32.mrf.mxu1  ;;  %v2118_v60 = vpop.f32.mrf.mxu0 }
 0x20f   : > { %v2007_v57 = vadd.f32 %v2006_v56, %v2005_v13  ;;  %v2119_v61 = vadd.f32 %v2118_v60, %v2117_v14 }
 0x210   : > { %v2008_v16 = vpop.f32.mrf.mxu1  ;;  %v2120_v17 = vpop.f32.mrf.mxu0 }
 0x211   : > { %v1288_v18 = vadd.f32 %v2119_v61, %v2007_v57 }
 0x212   : > { %v2009_v19 = vpop.f32.mrf.mxu1  ;;  %v2121_v20 = vpop.f32.mrf.mxu0 }
 0x213   : > { %v2010_v58 = vadd.f32 %v2009_v19, %v2008_v16  ;;  %v2122_v0 = vadd.f32 %v2121_v20, %v2120_v17  ;;  %v1705_v24 = vmul.f32 %v1548_v15, %v1288_v18  ;;  %v1578_v19 = vpop.permute.xlu0 %1577 }
 0x214   : > { %v2011_v21 = vpop.f32.mrf.mxu1  ;;  %v2123_v59 = vpop.f32.mrf.mxu0 }
 0x215   : > { %v1291_v23 = vadd.f32 %v2122_v0, %v2010_v58  ;;  %v1744_v29 = vadd.f32 %v2832_v1, %v1705_v24 }
 0x216   : > { %v2012_v22 = vpop.f32.mrf.mxu1  ;;  %v2124_v26 = vpop.f32.mrf.mxu0 }
 0x217   : > { %v2013_v27 = vadd.f32 %v2012_v22, %v2011_v21  ;;  %v2125_v28 = vadd.f32 %v2124_v26, %v2123_v59  ;;  %1776 = vst [vmem:[%s2839_s6] sm:$0xff] %v1744_v29  ;;  %v1706_v35 = vmul.f32 %v1553_v25, %v1291_v23  ;;  %v1583_v22 = vpop.permute.xlu1 %1582 }
 0x218   : > { %v2014_v30 = vpop.f32.mrf.mxu1  ;;  %v2126_v31 = vpop.f32.mrf.mxu0 }
 0x219   : > { %v1296_v34 = vadd.f32 %v2125_v28, %v2013_v27  ;;  %v1745_v33 = vadd.f32 %v2832_v1, %v1706_v35 }
 0x21a   : > { %v2015_v37 = vpop.f32.mrf.mxu1  ;;  %v2127_v42 = vpop.f32.mrf.mxu0 }
 0x21b   : > { %v2016_v43 = vadd.f32 %v2015_v37, %v2014_v30  ;;  %v2128_v32 = vadd.f32 %v2127_v42, %v2126_v31  ;;  %1777 = vst [vmem:[%s2839_s6 + $0x8] sm:$0xff] %v1745_v33  ;;  %v1707_v2 = vmul.f32 %v1558_v36, %v1296_v34  ;;  %v1588_v42 = vpop.permute.xlu0 %1587 }
 0x21c   : > { %v2017_v38 = vpop.f32.mrf.mxu1  ;;  %v2129_v39 = vpop.f32.mrf.mxu0 }
 0x21d   : > { %v1299_v54 = vadd.f32 %v2128_v32, %v2016_v43  ;;  %v1746_v47 = vadd.f32 %v2832_v1, %v1707_v2 }
 0x21e   : > { %v2018_v63 = vpop.f32.mrf.mxu1  ;;  %v2130_v41 = vpop.f32.mrf.mxu0 }
 0x21f   : > { %v2019_v46 = vadd.f32 %v2018_v63, %v2017_v38  ;;  %v2131_v40 = vadd.f32 %v2130_v41, %v2129_v39  ;;  %1778 = vst [vmem:[%s2839_s6 + $0x10] sm:$0xff] %v1746_v47  ;;  %v1708_v48 = vmul.f32 %v1563_v52, %v1299_v54  ;;  %v1593_v41 = vpop.permute.xlu1 %1592 }
 0x220   : > { %v2020_v53 = vpop.f32.mrf.mxu1  ;;  %v2132_v44 = vpop.f32.mrf.mxu0 }
 0x221   : > { %v1304_v45 = vadd.f32 %v2131_v40, %v2019_v46  ;;  %v1747_v4 = vadd.f32 %v2832_v1, %v1708_v48 }
 0x222   : > { %v2021_v49 = vpop.f32.mrf.mxu1  ;;  %v2133_v51 = vpop.f32.mrf.mxu0 }
 0x223   : > { %v2022_v50 = vadd.f32 %v2021_v49, %v2020_v53  ;;  %v2134_v62 = vadd.f32 %v2133_v51, %v2132_v44  ;;  %1779 = vst [vmem:[%s2839_s6 + $0x18] sm:$0xff] %v1747_v4  ;;  %v1709_v6 = vmul.f32 %v1568_v55, %v1304_v45 }
 0x224   : > { %v2023_v3 = vpop.f32.mrf.mxu1  ;;  %v2135_v5 = vpop.f32.mrf.mxu0 }
 0x225   : > { %v1307_v8 = vadd.f32 %v2134_v62, %v2022_v50  ;;  %v1748_v13 = vadd.f32 %v2832_v1, %v1709_v6  ;;  %v1598_v50 = vpop.permute.xlu0 %1597 }
 0x226   : > { %v2024_v7 = vpop.f32.mrf.mxu1  ;;  %v2136_v9 = vpop.f32.mrf.mxu0 }
 0x227   : > { %v2025_v10 = vadd.f32 %v2024_v7, %v2023_v3  ;;  %v2137_v11 = vadd.f32 %v2136_v9, %v2135_v5  ;;  %v1710_v57 = vmul.f32 %v1573_v12, %v1307_v8  ;;  %1780 = vst [vmem:[%s2839_s6 + $0x20] sm:$0xff] %v1748_v13  ;;  %v1603_v9 = vpop.permute.xlu1 %1602 }
 0x228   : > { %v2026_v14 = vpop.f32.mrf.mxu1  ;;  %v2138_v56 = vpop.f32.mrf.mxu0 }
 0x229   : > { %v1312_v60 = vadd.f32 %v2137_v11, %v2025_v10  ;;  %v1749_v18 = vadd.f32 %v2832_v1, %v1710_v57 }
 0x22a   : > { %v2027_v61 = vpop.f32.mrf.mxu1  ;;  %v2139_v15 = vpop.f32.mrf.mxu0 }
 0x22b   : > { %v2028_v16 = vadd.f32 %v2027_v61, %v2026_v14  ;;  %v2140_v17 = vadd.f32 %v2139_v15, %v2138_v56  ;;  %1781 = vst [vmem:[%s2839_s6 + $0x28] sm:$0xff] %v1749_v18  ;;  %v1711_v21 = vmul.f32 %v1578_v19, %v1312_v60 }
 0x22c   : > { %v2029_v20 = vpop.f32.mrf.mxu1  ;;  %v2141_v58 = vpop.f32.mrf.mxu0 }
 0x22d   : > { %v1315_v0 = vadd.f32 %v2140_v17, %v2028_v16  ;;  %v1750_v26 = vadd.f32 %v2832_v1, %v1711_v21  ;;  %v1608_v16 = vpop.permute.xlu0 %1607 }
 0x22e   : > { %v2030_v59 = vpop.f32.mrf.mxu1  ;;  %v2142_v23 = vpop.f32.mrf.mxu0 }
 0x22f   : > { %v2031_v24 = vadd.f32 %v2030_v59, %v2029_v20  ;;  %v2143_v25 = vadd.f32 %v2142_v23, %v2141_v58  ;;  %v1712_v30 = vmul.f32 %v1583_v22, %v1315_v0  ;;  %1782 = vst [vmem:[%s2839_s6 + $0x30] sm:$0xff] %v1750_v26  ;;  %v1613_v23 = vpop.permute.xlu1 %1612 }
 0x230   : > { %v2032_v27 = vpop.f32.mrf.mxu1  ;;  %v2144_v28 = vpop.f32.mrf.mxu0 }
 0x231   : > { %v1320_v29 = vadd.f32 %v2143_v25, %v2031_v24  ;;  %v1751_v37 = vadd.f32 %v2832_v1, %v1712_v30 }
 0x232   : > { %v2033_v31 = vpop.f32.mrf.mxu1  ;;  %v2145_v34 = vpop.f32.mrf.mxu0 }
 0x233   : > { %v2034_v35 = vadd.f32 %v2033_v31, %v2032_v27  ;;  %v2146_v36 = vadd.f32 %v2145_v34, %v2144_v28  ;;  %1783 = vst [vmem:[%s2839_s6 + $0x38] sm:$0xff] %v1751_v37  ;;  %v1713_v38 = vmul.f32 %v1588_v42, %v1320_v29 }
 0x234   : > { %v2035_v43 = vpop.f32.mrf.mxu1  ;;  %v2147_v32 = vpop.f32.mrf.mxu0 }
 0x235   : > { %v1323_v33 = vadd.f32 %v2146_v36, %v2034_v35  ;;  %v1752_v46 = vadd.f32 %v2832_v1, %v1713_v38  ;;  %v1618_v35 = vpop.permute.xlu0 %1617 }
 0x236   : > { %v2036_v39 = vpop.f32.mrf.mxu1  ;;  %v2148_v54 = vpop.f32.mrf.mxu0 }
 0x237   : > { %v2037_v2 = vadd.f32 %v2036_v39, %v2035_v43  ;;  %v2149_v63 = vadd.f32 %v2148_v54, %v2147_v32  ;;  %v1714_v53 = vmul.f32 %v1593_v41, %v1323_v33  ;;  %1784 = vst [vmem:[%s2839_s6 + $0x40] sm:$0xff] %v1752_v46  ;;  %v1623_v54 = vpop.permute.xlu1 %1622 }
 0x238   : > { %v2038_v40 = vpop.f32.mrf.mxu1  ;;  %v2150_v47 = vpop.f32.mrf.mxu0 }
 0x239   : > { %v1328_v52 = vadd.f32 %v2149_v63, %v2037_v2  ;;  %v1753_v51 = vadd.f32 %v2832_v1, %v1714_v53 }
 0x23a   : > { %v2039_v44 = vpop.f32.mrf.mxu1  ;;  %v2151_v45 = vpop.f32.mrf.mxu0 }
 0x23b   : > { %v2040_v48 = vadd.f32 %v2039_v44, %v2038_v40  ;;  %v2152_v49 = vadd.f32 %v2151_v45, %v2150_v47  ;;  %1785 = vst [vmem:[%s2839_s6 + $0x48] sm:$0xff] %v1753_v51  ;;  %v1715_v3 = vmul.f32 %v1598_v50, %v1328_v52 }
 0x23c   : > { %v2041_v62 = vpop.f32.mrf.mxu1  ;;  %v2153_v4 = vpop.f32.mrf.mxu0 }
 0x23d   : > { %v1331_v55 = vadd.f32 %v2152_v49, %v2040_v48  ;;  %v1754_v10 = vadd.f32 %v2832_v1, %v1715_v3  ;;  %v1628_v48 = vpop.permute.xlu0 %1627 }
 0x23e   : > { %v2042_v5 = vpop.f32.mrf.mxu1  ;;  %v2154_v8 = vpop.f32.mrf.mxu0 }
 0x23f   : > { %v2043_v6 = vadd.f32 %v2042_v5, %v2041_v62  ;;  %v2155_v7 = vadd.f32 %v2154_v8, %v2153_v4  ;;  %v1716_v14 = vmul.f32 %v1603_v9, %v1331_v55  ;;  %1786 = vst [vmem:[%s2839_s6 + $0x50] sm:$0xff] %v1754_v10  ;;  %v1633_v8 = vpop.permute.xlu1 %1632 }
 0x240   : > { %v2044_v11 = vpop.f32.mrf.mxu1  ;;  %v2156_v12 = vpop.f32.mrf.mxu0 }
 0x241   : > { %v1336_v13 = vadd.f32 %v2155_v7, %v2043_v6  ;;  %v1755_v15 = vadd.f32 %v2832_v1, %v1716_v14 }
 0x242   : > { %v2045_v56 = vpop.f32.mrf.mxu1  ;;  %v2157_v60 = vpop.f32.mrf.mxu0 }
 0x243   : > { %v2046_v57 = vadd.f32 %v2045_v56, %v2044_v11  ;;  %v2158_v61 = vadd.f32 %v2157_v60, %v2156_v12  ;;  %1787 = vst [vmem:[%s2839_s6 + $0x58] sm:$0xff] %v1755_v15  ;;  %v1717_v20 = vmul.f32 %v1608_v16, %v1336_v13 }
 0x244   : > { %v2047_v17 = vpop.f32.mrf.mxu1  ;;  %v2159_v18 = vpop.f32.mrf.mxu0 }
 0x245   : > { %v1339_v19 = vadd.f32 %v2158_v61, %v2046_v57  ;;  %v1756_v24 = vadd.f32 %v2832_v1, %v1717_v20  ;;  %v1638_v57 = vpop.permute.xlu0 %1637 }
 0x246   : > { %v2048_v58 = vpop.f32.mrf.mxu1  ;;  %v2160_v0 = vpop.f32.mrf.mxu0 }
 0x247   : > { %v2049_v21 = vadd.f32 %v2048_v58, %v2047_v17  ;;  %v2161_v59 = vadd.f32 %v2160_v0, %v2159_v18  ;;  %v1718_v27 = vmul.f32 %v1613_v23, %v1339_v19  ;;  %1788 = vst [vmem:[%s2839_s6 + $0x60] sm:$0xff] %v1756_v24  ;;  %v1643_v0 = vpop.permute.xlu1 %1642 }
 0x248   : > { %v2050_v25 = vpop.f32.mrf.mxu1  ;;  %v2162_v22 = vpop.f32.mrf.mxu0 }
 0x249   : > { %v1344_v26 = vadd.f32 %v2161_v59, %v2049_v21  ;;  %v1757_v34 = vadd.f32 %v2832_v1, %v1718_v27 }
 0x24a   : > { %v2051_v28 = vpop.f32.mrf.mxu1  ;;  %v2163_v29 = vpop.f32.mrf.mxu0 }
 0x24b   : > { %v2052_v30 = vadd.f32 %v2051_v28, %v2050_v25  ;;  %v2164_v31 = vadd.f32 %v2163_v29, %v2162_v22  ;;  %1789 = vst [vmem:[%s2839_s6 + $0x68] sm:$0xff] %v1757_v34  ;;  %v1719_v43 = vmul.f32 %v1618_v35, %v1344_v26 }
 0x24c   : > { %v2053_v36 = vpop.f32.mrf.mxu1  ;;  %v2165_v37 = vpop.f32.mrf.mxu0 }
 0x24d   : > { %v1347_v42 = vadd.f32 %v2164_v31, %v2052_v30  ;;  %v1758_v2 = vadd.f32 %v2832_v1, %v1719_v43  ;;  %v1648_v30 = vpop.permute.xlu0 %1647 }
 0x24e   : > { %v2054_v32 = vpop.f32.mrf.mxu1  ;;  %v2166_v33 = vpop.f32.mrf.mxu0 }
 0x24f   : > { %v2055_v38 = vadd.f32 %v2054_v32, %v2053_v36  ;;  %v2167_v39 = vadd.f32 %v2166_v33, %v2165_v37  ;;  %v1720_v40 = vmul.f32 %v1623_v54, %v1347_v42  ;;  %1790 = vst [vmem:[%s2839_s6 + $0x70] sm:$0xff] %v1758_v2  ;;  %v1653_v33 = vpop.permute.xlu1 %1652 }
 0x250   : > { %v2056_v63 = vpop.f32.mrf.mxu1  ;;  %v2168_v41 = vpop.f32.mrf.mxu0 }
 0x251   : > { %v1352_v46 = vadd.f32 %v2167_v39, %v2055_v38  ;;  %v1759_v45 = vadd.f32 %v2832_v1, %v1720_v40 }
 0x252   : > { %v2057_v47 = vpop.f32.mrf.mxu1  ;;  %v2169_v52 = vpop.f32.mrf.mxu0 }
 0x253   : > { %v2058_v53 = vadd.f32 %v2057_v47, %v2056_v63  ;;  %v2170_v44 = vadd.f32 %v2169_v52, %v2168_v41  ;;  %1791 = vst [vmem:[%s2839_s6 + $0x78] sm:$0xff] %v1759_v45  ;;  %v1721_v62 = vmul.f32 %v1628_v48, %v1352_v46 }
 0x254   : > { %v2059_v49 = vpop.f32.mrf.mxu1  ;;  %v2171_v51 = vpop.f32.mrf.mxu0 }
 0x255   : > { %v1355_v50 = vadd.f32 %v2170_v44, %v2058_v53  ;;  %v1760_v6 = vadd.f32 %v2832_v1, %v1721_v62  ;;  %v1658_v53 = vpop.permute.xlu0 %1657  ;;  %v1663_v62 = vpop.permute.xlu1 %1662 }
 0x256   : > { %v2060_v4 = vpop.f32.mrf.mxu1  ;;  %v2172_v55 = vpop.f32.mrf.mxu0 }
 0x257   : > { %v2061_v3 = vadd.f32 %v2060_v4, %v2059_v49  ;;  %v2173_v5 = vadd.f32 %v2172_v55, %v2171_v51  ;;  %v1722_v11 = vmul.f32 %v1633_v8, %v1355_v50  ;;  %1792 = vst [vmem:[%s2839_s6 + $0x80] sm:$0xff] %v1760_v6 }
 0x258   : > { %v2062_v7 = vpop.f32.mrf.mxu1  ;;  %v2174_v9 = vpop.f32.mrf.mxu0 }
 0x259   : > { %v1360_v10 = vadd.f32 %v2173_v5, %v2061_v3  ;;  %v1761_v60 = vadd.f32 %v2832_v1, %v1722_v11 }
 0x25a   : > { %v2063_v12 = vpop.f32.mrf.mxu1  ;;  %v2175_v13 = vpop.f32.mrf.mxu0 }
 0x25b   : > { %v2064_v14 = vadd.f32 %v2063_v12, %v2062_v7  ;;  %v2176_v56 = vadd.f32 %v2175_v13, %v2174_v9  ;;  %1793 = vst [vmem:[%s2839_s6 + $0x88] sm:$0xff] %v1761_v60  ;;  %v1723_v17 = vmul.f32 %v1638_v57, %v1360_v10  ;;  %v1668_v12 = vpop.permute.xlu0 %1667 }
 0x25c   : > { %v2065_v61 = vpop.f32.mrf.mxu1  ;;  %v2177_v15 = vpop.f32.mrf.mxu0 }
 0x25d   : > { %v1363_v16 = vadd.f32 %v2176_v56, %v2064_v14  ;;  %v1762_v21 = vadd.f32 %v2832_v1, %v1723_v17  ;;  %v1673_v17 = vpop.permute.xlu1 %1672 }
 0x25e   : > { %v2066_v18 = vpop.f32.mrf.mxu1  ;;  %v2178_v19 = vpop.f32.mrf.mxu0 }
 0x25f   : > { %v2067_v20 = vadd.f32 %v2066_v18, %v2065_v61  ;;  %v2179_v58 = vadd.f32 %v2178_v19, %v2177_v15  ;;  %v1724_v25 = vmul.f32 %v1643_v0, %v1363_v16  ;;  %1794 = vst [vmem:[%s2839_s6 + $0x90] sm:$0xff] %v1762_v21 }
 0x260   : > { %v2068_v59 = vpop.f32.mrf.mxu1  ;;  %v2180_v23 = vpop.f32.mrf.mxu0 }
 0x261   : > { %v1368_v24 = vadd.f32 %v2179_v58, %v2067_v20  ;;  %v1763_v29 = vadd.f32 %v2832_v1, %v1724_v25 }
 0x262   : > { %v2069_v22 = vpop.f32.mrf.mxu1  ;;  %v2181_v26 = vpop.f32.mrf.mxu0 }
 0x263   : > { %v2070_v27 = vadd.f32 %v2069_v22, %v2068_v59  ;;  %v2182_v28 = vadd.f32 %v2181_v26, %v2180_v23  ;;  %1795 = vst [vmem:[%s2839_s6 + $0x98] sm:$0xff] %v1763_v29  ;;  %v1725_v36 = vmul.f32 %v1648_v30, %v1368_v24  ;;  %v1678_v22 = vpop.permute.xlu0 %1677 }
 0x264   : > { %v2071_v31 = vpop.f32.mrf.mxu1  ;;  %v2183_v34 = vpop.f32.mrf.mxu0 }
 0x265   : > { %v1371_v35 = vadd.f32 %v2182_v28, %v2070_v27  ;;  %v1764_v38 = vadd.f32 %v2832_v1, %v1725_v36  ;;  %v1683_v36 = vpop.permute.xlu1 %1682 }
 0x266   : > { %v2072_v37 = vpop.f32.mrf.mxu1  ;;  %v2184_v42 = vpop.f32.mrf.mxu0 }
 0x267   : > { %v2073_v43 = vadd.f32 %v2072_v37, %v2071_v31  ;;  %v2185_v32 = vadd.f32 %v2184_v42, %v2183_v34  ;;  %v1726_v63 = vmul.f32 %v1653_v33, %v1371_v35  ;;  %1796 = vst [vmem:[%s2839_s6 + $0xa0] sm:$0xff] %v1764_v38 }
 0x268   : > { %v2074_v39 = vpop.f32.mrf.mxu1  ;;  %v2186_v54 = vpop.f32.mrf.mxu0 }
 0x269   : > { %v1376_v2 = vadd.f32 %v2185_v32, %v2073_v43  ;;  %v1765_v40 = vadd.f32 %v2832_v1, %v1726_v63  ;;  %v1688_v63 = vpop.permute.xlu0 %1687 }
 0x26a   : > { %v2075_v41 = vpop.f32.mrf.mxu1  ;;  %v2187_v46 = vpop.f32.mrf.mxu0 }
 0x26b   : > { %v2076_v47 = vadd.f32 %v2075_v41, %v2074_v39  ;;  %v2188_v52 = vadd.f32 %v2187_v46, %v2186_v54  ;;  %1797 = vst [vmem:[%s2839_s6 + $0xa8] sm:$0xff] %v1765_v40  ;;  %v1727_v49 = vmul.f32 %v1658_v53, %v1376_v2 }
 0x26c   : > { %v2077_v44 = vpop.f32.mrf.mxu1  ;;  %v2189_v45 = vpop.f32.mrf.mxu0 }
 0x26d   : > { %v1379_v48 = vadd.f32 %v2188_v52, %v2076_v47  ;;  %v1766_v4 = vadd.f32 %v2832_v1, %v1727_v49  ;;  %v1693_v49 = vpop.permute.xlu1 %1692 }
 0x26e   : > { %v2078_v51 = vpop.f32.mrf.mxu1  ;;  %v2190_v50 = vpop.f32.mrf.mxu0 }
 0x26f   : > { %v2079_v55 = vadd.f32 %v2078_v51, %v2077_v44  ;;  %v2191_v3 = vadd.f32 %v2190_v50, %v2189_v45  ;;  %v1728_v6 = vmul.f32 %v1663_v62, %v1379_v48  ;;  %1798 = vst [vmem:[%s2839_s6 + $0xb0] sm:$0xff] %v1766_v4 }
 0x270   : > { %v2080_v5 = vpop.f32.mrf.mxu1  ;;  %v2192_v8 = vpop.f32.mrf.mxu0 }
 0x271   : > { %v1384_v7 = vadd.f32 %v2191_v3, %v2079_v55  ;;  %v1767_v11 = vadd.f32 %v2832_v1, %v1728_v6 }
 0x272   : > { %v2081_v9 = vpop.f32.mrf.mxu1  ;;  %v2193_v10 = vpop.f32.mrf.mxu0 }
 0x273   : > { %v2082_v13 = vadd.f32 %v2081_v9, %v2080_v5  ;;  %v2194_v14 = vadd.f32 %v2193_v10, %v2192_v8  ;;  %1799 = vst [vmem:[%s2839_s6 + $0xb8] sm:$0xff] %v1767_v11  ;;  %v1729_v57 = vmul.f32 %v1668_v12, %v1384_v7  ;;  %v1698_v11 = vpop.permute.xlu0 %1697 }
 0x274   : > { %v2083_v56 = vpop.f32.mrf.mxu1  ;;  %v2195_v60 = vpop.f32.mrf.mxu0 }
 0x275   : > { %v1387_v61 = vadd.f32 %v2194_v14, %v2082_v13  ;;  %v1768_v18 = vadd.f32 %v2832_v1, %v1729_v57 }
 0x276   : > { %v2084_v15 = vpop.f32.mrf.mxu1  ;;  %v2196_v16 = vpop.f32.mrf.mxu0 }
 0x277   : > { %v2085_v19 = vadd.f32 %v2084_v15, %v2083_v56  ;;  %v2197_v20 = vadd.f32 %v2196_v16, %v2195_v60  ;;  %1800 = vst [vmem:[%s2839_s6 + $0xc0] sm:$0xff] %v1768_v18  ;;  %v1730_v21 = vmul.f32 %v1673_v17, %v1387_v61  ;;  %v1703_v56 = vpop.permute.xlu1 %1702 }
 0x278   : > { %v2086_v58 = vpop.f32.mrf.mxu1  ;;  %v2198_v0 = vpop.f32.mrf.mxu0 }
 0x279   : > { %v1392_v59 = vadd.f32 %v2197_v20, %v2085_v19  ;;  %v1769_v25 = vadd.f32 %v2832_v1, %v1730_v21 }
 0x27a   : > { %v2087_v23 = vpop.f32.mrf.mxu1  ;;  %v2199_v24 = vpop.f32.mrf.mxu0 }
 0x27b   : > { %v2088_v26 = vadd.f32 %v2087_v23, %v2086_v58  ;;  %v2200_v27 = vadd.f32 %v2199_v24, %v2198_v0  ;;  %1801 = vst [vmem:[%s2839_s6 + $0xc8] sm:$0xff] %v1769_v25  ;;  %v1731_v30 = vmul.f32 %v1678_v22, %v1392_v59 }
 0x27c   : > { %v2089_v28 = vpop.f32.mrf.mxu1  ;;  %v2201_v29 = vpop.f32.mrf.mxu0 }
 0x27d   : > { %v1395_v31 = vadd.f32 %v2200_v27, %v2088_v26  ;;  %v1770_v37 = vadd.f32 %v2832_v1, %v1731_v30 }
 0x27e   : > { %v2090_v34 = vpop.f32.mrf.mxu1  ;;  %v2202_v35 = vpop.f32.mrf.mxu0 }
 0x27f   : > { %v2091_v42 = vadd.f32 %v2090_v34, %v2089_v28  ;;  %v2203_v43 = vadd.f32 %v2202_v35, %v2201_v29  ;;  %1802 = vst [vmem:[%s2839_s6 + $0xd0] sm:$0xff] %v1770_v37  ;;  %v1732_v38 = vmul.f32 %v1683_v36, %v1395_v31 }
 0x280   : > { %v2092_v32 = vpop.f32.mrf.mxu1  ;;  %v2204_v33 = vpop.f32.mrf.mxu0 }
 0x281   : > { %v1400_v39 = vadd.f32 %v2203_v43, %v2091_v42  ;;  %v1771_v41 = vadd.f32 %v2832_v1, %v1732_v38 }
 0x282   : > { %v2093_v54 = vpop.f32.mrf.mxu1  ;;  %v2205_v2 = vpop.f32.mrf.mxu0 }
 0x283   : > { %v2094_v46 = vadd.f32 %v2093_v54, %v2092_v32  ;;  %v2206_v40 = vadd.f32 %v2205_v2, %v2204_v33  ;;  %1803 = vst [vmem:[%s2839_s6 + $0xd8] sm:$0xff] %v1771_v41  ;;  %v1733_v53 = vmul.f32 %v1688_v63, %v1400_v39 }
 0x284   : > { %v2095_v47 = vpop.f32.mrf.mxu1  ;;  %v2207_v52 = vpop.f32.mrf.mxu0 }
 0x285   : > { %v1403_v44 = vadd.f32 %v2206_v40, %v2094_v46  ;;  %v1772_v51 = vadd.f32 %v2832_v1, %v1733_v53 }
 0x286   : > { %v2096_v45 = vpop.f32.mrf.mxu1  ;;  %v2208_v48 = vpop.f32.mrf.mxu0 }
 0x287   : > { %v2097_v50 = vadd.f32 %v2096_v45, %v2095_v47  ;;  %v2209_v62 = vadd.f32 %v2208_v48, %v2207_v52  ;;  %1804 = vst [vmem:[%s2839_s6 + $0xe0] sm:$0xff] %v1772_v51  ;;  %v1734_v3 = vmul.f32 %v1693_v49, %v1403_v44 }
 0x288   : > { %v2098_v4 = vpop.f32.mrf.mxu1  ;;  %v2210_v55 = vpop.f32.mrf.mxu0 }
 0x289   : > { %v1408_v5 = vadd.f32 %v2209_v62, %v2097_v50  ;;  %v1773_v7 = vadd.f32 %v2832_v1, %v1734_v3 }
 0x28a   : > { %v2099_v8 = vpop.f32.mrf.mxu1  ;;  %v2211_v6 = vpop.f32.mrf.mxu0 }
 0x28b   : > { %v2100_v9 = vadd.f32 %v2099_v8, %v2098_v4  ;;  %v2212_v10 = vadd.f32 %v2211_v6, %v2210_v55  ;;  %1805 = vst [vmem:[%s2839_s6 + $0xe8] sm:$0xff] %v1773_v7  ;;  %v1735_v12 = vmul.f32 %v1698_v11, %v1408_v5 }
 0x28d   : > { %v1411_v13 = vadd.f32 %v2212_v10, %v2100_v9  ;;  %v1774_v14 = vadd.f32 %v2832_v1, %v1735_v12 }
 0x28f   : > { %1806 = vst [vmem:[%s2839_s6 + $0xf0] sm:$0xff] %v1774_v14  ;;  %v1736_v60 = vmul.f32 %v1703_v56, %v1411_v13 }
 0x291   : > { %v1775_v57 = vadd.f32 %v2832_v1, %v1736_v60 }
 0x293   : > { %1807 = vst [vmem:[%s2839_s6 + $0xf8] sm:$0xff] %v1775_v57 }
 0x294 PF: > { %s15_s20 = sadd.s32 1, %s2399_s20   ;;  %s2962_s18 = smov %s2395_s19 }
 0x295   : > { %p12_p6 = scmp.ge.s32.totalorder %s15_s20, 4   ;;  %s2963_s19 = smov %s2965_s21 }
 0x297   :  { %14 = sbr.rel (!%p12_p6) target bundleno = 2 (0x2), region = 82 }

// kernel: gcn_emb.2
= control target key start
LH: loop header
LB: loop body
LE: loop exit
PB: predicated region body
PF: predicated region fallthrough
CT: control target
= control target key end

     0   :  { %s2464_s18 = smov 0   ;;  %s2466_s19 = smov 0   ;;  %s2946_s0 = inlined_call_operand.vmem [shape: s8[512,512], index: 0, kind: input, shape index: {}]   ;;  %s2947_s1 = inlined_call_operand.vmem [shape: bf16[512,128], index: 1, kind: input, shape index: {}]   ;;  %s2948_s2 = inlined_call_operand.vmem [shape: bf16[128,128], index: 2, kind: input, shape index: {}]   ;;  %s2949_s3 = inlined_call_operand.vmem [shape: f32[512,1], index: 3, kind: input, shape index: {}]   ;;  %s2950_s4 = inlined_call_operand.vmem [shape: f32[1,128], index: 4, kind: input, shape index: {}]   ;;  %s2951_s5 = inlined_call_operand.vmem [shape: f32[512,128], index: 5, kind: output, shape index: {}]  }
   0x1   :  { %s2468_s20 = smov 0  }
   0x2 LB: > { %s27_s21 = sadd.s32 1, %s2427_s19  ;;  %p1929_p0 = scmp.ge.s32.totalorder %s2431_s20, 1  ;;  %s2431_s20 = sphi %s2468_s20, %s15_s20   ;;  %s2427_s19 = sphi %s2466_s19, %s2995_s19   ;;  %s2423_s18 = sphi %s2464_s18, %s2994_s18  }
   0x3   : > { %p29_p1 = scmp.ge.s32.totalorder %s27_s21, 2  ;;  %p219_p2 = scmp.lt.s32.totalorder %s2431_s20, 3 }
   0x5   : > { %s2997_s21 = smov (%p29_p1, %s27_s21), 0  ;;  %p220_p3 = pnand %p1929_p0, %p219_p2 }
   0x7   : > { %223 = sbr.rel (%p220_p3) target bundleno = 662 (0x296), region = 40 }
   0xc   : > { %v2369_v0 = vld [vmem:[%s2948_s2 + $0x38] sm:$0xff]   ;;  %v2370_v1 = vld [vmem:[%s2948_s2 + $0x30] sm:$0xff]   ;;  %v2371_v2 = vld [vmem:[%s2948_s2 + $0x28] sm:$0xff]   ;;  %s1930_s14 = sshll.u32 %s2423_s18, 3  ;;  %s1933_s23 = sshll.u32 %s2423_s18, 5 }
   0xd   : > { %2245 = vmatprep.subr.bf16.mxu0 %v2369_v0  ;;  %2325 = vmatprep.subr.bf16.mxu1 %v2369_v0  ;;  %v2372_v3 = vld [vmem:[%s2948_s2 + $0x20] sm:$0xff]   ;;  %v2373_v6 = vld [vmem:[%s2948_s2 + $0x18] sm:$0xff]   ;;  %v2374_v7 = vld [vmem:[%s2948_s2 + $0x10] sm:$0xff]   ;;  %p259_p4 = scmp.lt.s32.totalorder %s1930_s14, 15  ;;  %p270_p5 = scmp.lt.s32.totalorder %s1933_s23, 63 }
   0xe   : > { %2246 = vmatpush3.bf16.msra.mxu0 %v2369_v0  ;;  %2333 = vmatpush3.bf16.msra.mxu1 %v2369_v0  ;;  %v2377_v4 = vld [vmem:[%s2947_s1] sm:$0xff]   ;;  %v2375_v8 = vld [vmem:[%s2948_s2 + $0x8] sm:$0xff]   ;;  %v2381_v12 = vld [vmem:[%s2947_s1 + $0x10] sm:$0xff]  }
   0xf   : > { %2247 = vmatprep.subr.bf16.mxu0 %v2370_v1  ;;  %2326 = vmatprep.subr.bf16.mxu1 %v2370_v1  ;;  %v2378_v5 = vld [vmem:[%s2947_s1 + $0x80] sm:$0xff]   ;;  %v2379_v10 = vld [vmem:[%s2947_s1 + $0x8] sm:$0xff]   ;;  %v2382_v13 = vld [vmem:[%s2947_s1 + $0x90] sm:$0xff]   ;;  %s2999_s14 = smov (!%p259_p4, %s1930_s14), 15  ;;  %s3001_s23 = smov (!%p270_p5, %s1933_s23), 63 }
  0x10   : > { %2261 = vmatprep.mubr.bf16.mxu0 %v2377_v4  ;;  %2293 = vmatprep.mubr.bf16.mxu1 %v2378_v5  ;;  %v2376_v9 = vld [vmem:[%s2948_s2] sm:$0xff]   ;;  %v2380_v11 = vld [vmem:[%s2947_s1 + $0x88] sm:$0xff]   ;;  %v2383_v14 = vld [vmem:[%s2947_s1 + $0x18] sm:$0xff]   ;;  %s1980_s15 = sshll.u32 %s2999_s14, 5  ;;  %s1934_s24 = sshll.u32 %s3001_s23, 3 }
  0x11   : > { %v2384_v15 = vld [vmem:[%s2947_s1 + $0x98] sm:$0xff]   ;;  %v2385_v16 = vld [vmem:[%s2947_s1 + $0x20] sm:$0xff]   ;;  %v2387_v18 = vld [vmem:[%s2947_s1 + $0x28] sm:$0xff]   ;;  %s2608_s22 = scalar_lea.vmem %s2946_s0, %s1980_s15  ;;  %s2731_s26 = scalar_lea.vmem %s2949_s3, %s1934_s24 }
  0x12   : > { %2248 = vmatpush3.bf16.msra.mxu0 %v2370_v1  ;;  %2334 = vmatpush3.bf16.msra.mxu1 %v2370_v1  ;;  %v2386_v17 = vld [vmem:[%s2947_s1 + $0xa0] sm:$0xff]   ;;  %v2388_v19 = vld [vmem:[%s2947_s1 + $0xa8] sm:$0xff]   ;;  %v2389_v20 = vld [vmem:[%s2947_s1 + $0x30] sm:$0xff]   ;;  %s2872_s6 = scalar_lea.vmem %s2951_s5, %s1934_s24 }
  0x13   : > { %2249 = vmatprep.subr.bf16.mxu0 %v2371_v2  ;;  %2327 = vmatprep.subr.bf16.mxu1 %v2371_v2  ;;  %v2390_v21 = vld [vmem:[%s2947_s1 + $0xb0] sm:$0xff]   ;;  %v2391_v22 = vld [vmem:[%s2947_s1 + $0x38] sm:$0xff]   ;;  %v2393_v24 = vld [vmem:[%s2947_s1 + $0x40] sm:$0xff]  }
  0x14   : > { %v2392_v23 = vld [vmem:[%s2947_s1 + $0xb8] sm:$0xff]   ;;  %v2394_v25 = vld [vmem:[%s2947_s1 + $0xc0] sm:$0xff]   ;;  %v2395_v26 = vld [vmem:[%s2947_s1 + $0x48] sm:$0xff]  }
  0x15   : > { %v2396_v27 = vld [vmem:[%s2947_s1 + $0xc8] sm:$0xff]   ;;  %v2397_v28 = vld [vmem:[%s2947_s1 + $0x50] sm:$0xff]   ;;  %v2399_v30 = vld [vmem:[%s2947_s1 + $0x58] sm:$0xff]  }
  0x16   : > { %2250 = vmatpush3.bf16.msra.mxu0 %v2371_v2  ;;  %2335 = vmatpush3.bf16.msra.mxu1 %v2371_v2  ;;  %v2398_v29 = vld [vmem:[%s2947_s1 + $0xd0] sm:$0xff]   ;;  %v2400_v31 = vld [vmem:[%s2947_s1 + $0xd8] sm:$0xff]   ;;  %v2401_v32 = vld [vmem:[%s2947_s1 + $0x60] sm:$0xff]  }
  0x17   : > { %2251 = vmatprep.subr.bf16.mxu0 %v2372_v3  ;;  %2328 = vmatprep.subr.bf16.mxu1 %v2372_v3  ;;  %v2402_v33 = vld [vmem:[%s2947_s1 + $0xe0] sm:$0xff]   ;;  %v2403_v34 = vld [vmem:[%s2947_s1 + $0x68] sm:$0xff]   ;;  %v2405_v36 = vld [vmem:[%s2947_s1 + $0x70] sm:$0xff]  }
  0x18   : > { %v2404_v35 = vld [vmem:[%s2947_s1 + $0xe8] sm:$0xff]   ;;  %v2406_v37 = vld [vmem:[%s2947_s1 + $0xf0] sm:$0xff]   ;;  %v2407_v38 = vld [vmem:[%s2947_s1 + $0x78] sm:$0xff]  }
  0x19   : > { %v2408_v39 = vld [vmem:[%s2947_s1 + $0xf8] sm:$0xff]   ;;  %v2611_v40 = vld [vmem:[%s2608_s22 + $0x8] sm:$0xff]  ;;  %v1517_v63 = vld [vmem:[%s2731_s26 + $0x20] sm:$0xff] }
  0x1a   : > { %2252 = vmatpush3.bf16.msra.mxu0 %v2372_v3  ;;  %2336 = vmatpush3.bf16.msra.mxu1 %v2372_v3  ;;  %2962 = vst [vmem:[#allocation2_spill] sm:$0xff] %v2611_v40  ;;  %v2614_v41 = vld [vmem:[%s2608_s22 + $0x18] sm:$0xff]  ;;  %v997_v42 = vunpack.c.l.s8.bf16 %v2611_v40  ;;  %v1518_v2 = vld [vmem:[%s2731_s26 + $0x28] sm:$0xff] }
  0x1b   : > { %2253 = vmatprep.subr.bf16.mxu0 %v2373_v6  ;;  %2329 = vmatprep.subr.bf16.mxu1 %v2373_v6  ;;  %2963 = vst [vmem:[#allocation3_spill] sm:$0xff] %v2614_v41  ;;  %v999_v43 = vunpack.c.l.s8.bf16 %v2614_v41  ;;  %v1516_v54 = vld [vmem:[%s2731_s26 + $0x18] sm:$0xff] }
  0x1e   : > { %2254 = vmatpush3.bf16.msra.mxu0 %v2373_v6  ;;  %2337 = vmatpush3.bf16.msra.mxu1 %v2373_v6 }
  0x1f   : > { %2255 = vmatprep.subr.bf16.mxu0 %v2374_v7  ;;  %2330 = vmatprep.subr.bf16.mxu1 %v2374_v7 }
  0x22   : > { %2256 = vmatpush3.bf16.msra.mxu0 %v2374_v7  ;;  %2338 = vmatpush3.bf16.msra.mxu1 %v2374_v7 }
  0x23   : > { %2257 = vmatprep.subr.bf16.mxu0 %v2375_v8  ;;  %2331 = vmatprep.subr.bf16.mxu1 %v2375_v8 }
  0x26   : > { %2258 = vmatpush3.bf16.msra.mxu0 %v2375_v8  ;;  %2339 = vmatpush3.bf16.msra.mxu1 %v2375_v8 }
  0x27   : > { %2259 = vmatprep.subr.bf16.mxu0 %v2376_v9  ;;  %2332 = vmatprep.subr.bf16.mxu1 %v2376_v9 }
  0x2a   : > { %2260 = vmatpush3.bf16.msra.mxu0 %v2376_v9  ;;  %2340 = vmatpush3.bf16.msra.mxu1 %v2376_v9 }
  0x2d   : > { %2262 = vmatmul.mubr.bf16.vlgmr.msra.gmra.mxu0 %v2379_v10  ;;  %2294 = vmatmul.mubr.bf16.vlgmr.msra.gmra.mxu1 %v2380_v11 }
  0x2e   : > { %2265 = vmatprep.mubr.bf16.mxu0 %v2381_v12  ;;  %2297 = vmatprep.mubr.bf16.mxu1 %v2382_v13 }
  0x35   : > { %2266 = vmatmul.mubr.bf16.gmra.mxu0 %v2383_v14  ;;  %2298 = vmatmul.mubr.bf16.gmra.mxu1 %v2384_v15 }
  0x36   : > { %2269 = vmatprep.mubr.bf16.mxu0 %v2385_v16  ;;  %2301 = vmatprep.mubr.bf16.mxu1 %v2386_v17 }
  0x3d   : > { %2270 = vmatmul.mubr.bf16.gmra.mxu0 %v2387_v18  ;;  %2302 = vmatmul.mubr.bf16.gmra.mxu1 %v2388_v19 }
  0x3e   : > { %2273 = vmatprep.mubr.bf16.mxu0 %v2389_v20  ;;  %2305 = vmatprep.mubr.bf16.mxu1 %v2390_v21 }
  0x45   : > { %2274 = vmatmul.mubr.bf16.gmra.mxu0 %v2391_v22  ;;  %2306 = vmatmul.mubr.bf16.gmra.mxu1 %v2392_v23 }
  0x46   : > { %2277 = vmatprep.mubr.bf16.mxu0 %v2393_v24  ;;  %2309 = vmatprep.mubr.bf16.mxu1 %v2394_v25 }
  0x4d   : > { %2278 = vmatmul.mubr.bf16.gmra.mxu0 %v2395_v26  ;;  %2310 = vmatmul.mubr.bf16.gmra.mxu1 %v2396_v27 }
  0x4e   : > { %2281 = vmatprep.mubr.bf16.mxu0 %v2397_v28  ;;  %2313 = vmatprep.mubr.bf16.mxu1 %v2398_v29 }
  0x55   : > { %2282 = vmatmul.mubr.bf16.gmra.mxu0 %v2399_v30  ;;  %2314 = vmatmul.mubr.bf16.gmra.mxu1 %v2400_v31 }
  0x56   : > { %2285 = vmatprep.mubr.bf16.mxu0 %v2401_v32  ;;  %2317 = vmatprep.mubr.bf16.mxu1 %v2402_v33  ;;  %v2433_v32 = vmov 0   ;;  %v1513_v33 = vld [vmem:[%s2731_s26] sm:$0xff] }
  0x57   : > { %2367 = vset.pattern.permute.xlu0 %v2433_v32  ;;  %2368 = vset.pattern.permute.xlu1 %v2433_v32 }
  0x58   : > { %1547 = vperm.xlu0 %2367, %v1513_v33  }
  0x5d   : > { %2286 = vmatmul.mubr.bf16.gmra.mxu0 %v2403_v34  ;;  %2318 = vmatmul.mubr.bf16.gmra.mxu1 %v2404_v35 }
  0x5e   : > { %2289 = vmatprep.mubr.bf16.mxu0 %v2405_v36  ;;  %2321 = vmatprep.mubr.bf16.mxu1 %v2406_v37 }
  0x65   : > { %2290 = vmatmul.mubr.bf16.gmra.mxu0 %v2407_v38  ;;  %2322 = vmatmul.mubr.bf16.gmra.mxu1 %v2408_v39  ;;  %v1514_v38 = vld [vmem:[%s2731_s26 + $0x8] sm:$0xff]  ;;  %v1515_v39 = vld [vmem:[%s2731_s26 + $0x10] sm:$0xff] }
  0x66   : > { %1124 = vmatprep.mubr.bf16.mxu1 %v997_v42  ;;  %1285 = vmatprep.mubr.bf16.mxu0 %v999_v43 }
  0x67   : > { %1552 = vperm.xlu0 %2367, %v1514_v38   ;;  %1557 = vperm.xlu1 %2368, %v1515_v39   ;;  %v1520_v38 = vld [vmem:[%s2731_s26 + $0x38] sm:$0xff]  ;;  %v1519_v39 = vld [vmem:[%s2731_s26 + $0x30] sm:$0xff] }
  0x6b   : > { %1562 = vperm.xlu1 %2368, %v1516_v54   ;;  %1567 = vperm.xlu0 %2367, %v1517_v63  }
  0x6f   : > { %1572 = vperm.xlu1 %2368, %v1518_v2   ;;  %1577 = vperm.xlu0 %2367, %v1519_v39   ;;  %v969_v39 = vld [vmem:[%s2608_s22 + $0x28] sm:$0xff] }
  0x73   : > { %1582 = vperm.xlu1 %2368, %v1520_v38   ;;  %v1537_v38 = vld [vmem:[%s2731_s26 + $0xc0] sm:$0xff] }
  0xed   : > { %v2618_v44 = vpop.f32.mrf.mxu0  ;;  %v2620_v45 = vpop.f32.mrf.mxu1 }
  0xee   : > { %2964 = vst [vmem:[#allocation4_spill] sm:$0xff] %v2618_v44  ;;  %2965 = vst [vmem:[#allocation5_spill] sm:$0xff] %v2620_v45 }
  0xef   : > { %v2622_v46 = vpop.f32.mrf.mxu0  ;;  %v2624_v47 = vpop.f32.mrf.mxu1 }
  0xf0   : > { %2966 = vst [vmem:[#allocation6_spill] sm:$0xff] %v2622_v46  ;;  %2967 = vst [vmem:[#allocation7_spill] sm:$0xff] %v2624_v47 }
  0xf1   : > { %v2626_v48 = vpop.f32.mrf.mxu0  ;;  %v2628_v49 = vpop.f32.mrf.mxu1 }
  0xf2   : > { %2968 = vst [vmem:[#allocation8_spill] sm:$0xff] %v2626_v48  ;;  %2969 = vst [vmem:[#allocation9_spill] sm:$0xff] %v2628_v49 }
  0xf3   : > { %v2634_v52 = vpop.f32.mrf.mxu0  ;;  %v2636_v53 = vpop.f32.mrf.mxu1 }
  0xf4   : > { %2970 = vst [vmem:[#allocation10_spill] sm:$0xff] %v2634_v52  ;;  %2971 = vst [vmem:[#allocation11_spill] sm:$0xff] %v2636_v53 }
  0xf5   : > { %v2642_v56 = vpop.f32.mrf.mxu0  ;;  %v2644_v57 = vpop.f32.mrf.mxu1 }
  0xf7   : > { %v2646_v58 = vpop.f32.mrf.mxu0  ;;  %v2648_v59 = vpop.f32.mrf.mxu1 }
  0xf9   : > { %v2650_v60 = vpop.f32.mrf.mxu0  ;;  %v2652_v61 = vpop.f32.mrf.mxu1 }
  0xfb   : > { %v2658_v0 = vpop.f32.mrf.mxu0  ;;  %v2660_v1 = vpop.f32.mrf.mxu1 }
  0xfd   : > { %v2666_v4 = vpop.f32.mrf.mxu0  ;;  %v2668_v5 = vpop.f32.mrf.mxu1 }
  0xff   : > { %v2670_v6 = vpop.f32.mrf.mxu0  ;;  %v2672_v7 = vpop.f32.mrf.mxu1 }
 0x101   : > { %v2674_v8 = vpop.f32.mrf.mxu0  ;;  %v2676_v9 = vpop.f32.mrf.mxu1 }
 0x103   : > { %v2678_v10 = vpop.f32.mrf.mxu0  ;;  %v2680_v11 = vpop.f32.mrf.mxu1 }
 0x105   : > { %v2682_v12 = vpop.f32.mrf.mxu0  ;;  %v2684_v13 = vpop.f32.mrf.mxu1 }
 0x107   : > { %v2686_v14 = vpop.f32.mrf.mxu0  ;;  %v2688_v15 = vpop.f32.mrf.mxu1 }
 0x109   : > { %v2690_v16 = vpop.f32.mrf.mxu0  ;;  %v2692_v17 = vpop.f32.mrf.mxu1 }
 0x10a   : > { %v939_v45 = vpack.c.bf16 %v2690_v16, %v2682_v12  ;;  %v955_v49 = vpack.c.bf16 %v2692_v17, %v2684_v13  ;;  %v2975_v12 = vpack.c.bf16 %v2652_v61, %v2644_v57  ;;  %v2976_v57 = vpack.c.bf16 %v2658_v0, %v2646_v58  ;;  %v2980_v58 = vld [vmem:[#allocation8_spill] sm:$0xff] }
 0x10b   : > { %v2694_v18 = vpop.f32.mrf.mxu0  ;;  %v2696_v19 = vpop.f32.mrf.mxu1  ;;  %v2977_v61 = vpack.c.bf16 %v2660_v1, %v2648_v59  ;;  %v2981_v0 = vld [vmem:[#allocation4_spill] sm:$0xff]  ;;  %v2983_v59 = vld [vmem:[#allocation9_spill] sm:$0xff] }
 0x10c   : > { %v2984_v1 = vld [vmem:[#allocation5_spill] sm:$0xff] }
 0x10d   : > { %v2698_v20 = vpop.f32.mrf.mxu0  ;;  %v2700_v21 = vpop.f32.mrf.mxu1 }
 0x10f   : > { %v2702_v22 = vpop.f32.mrf.mxu0  ;;  %v2704_v23 = vpop.f32.mrf.mxu1 }
 0x110   : > { %2972 = vst [vmem:[#allocation12_spill] sm:$0xff] %v2704_v23  ;;  %v1521_v23 = vld [vmem:[%s2731_s26 + $0x40] sm:$0xff] }
 0x111   : > { %v2706_v24 = vpop.f32.mrf.mxu0  ;;  %v2708_v25 = vpop.f32.mrf.mxu1  ;;  %1587 = vperm.xlu0 %2367, %v1521_v23   ;;  %v2985_v23 = vpack.c.bf16 %v2983_v59, %v2984_v1  ;;  %v983_v59 = vld [vmem:[%s2608_s22 + $0x98] sm:$0xff] }
 0x112   : > { %v941_v13 = vpack.c.bf16 %v2706_v24, %v2698_v20  ;;  %v1533_v20 = vld [vmem:[%s2731_s26 + $0xa0] sm:$0xff] }
 0x113   : > { %v2711_v26 = vpop.f32.mrf.mxu0  ;;  %v2713_v27 = vpop.f32.mrf.mxu1  ;;  %v964_v24 = vld [vmem:[%s2608_s22] sm:$0xff] }
 0x114   : > { %2973 = vst [vmem:[#allocation13_spill] sm:$0xff] %v2713_v27  ;;  %v1522_v27 = vld [vmem:[%s2731_s26 + $0x48] sm:$0xff] }
 0x115   : > { %v2717_v28 = vpop.f32.mrf.mxu0  ;;  %v2719_v29 = vpop.f32.mrf.mxu1  ;;  %1592 = vperm.xlu1 %2368, %v1522_v27   ;;  %v1536_v27 = vld [vmem:[%s2731_s26 + $0xb8] sm:$0xff] }
 0x117   : > { %v2722_v30 = vpop.f32.mrf.mxu0  ;;  %v2724_v31 = vpop.f32.mrf.mxu1  ;;  %v2978_v16 = vld [vmem:[#allocation12_spill] sm:$0xff] }
 0x119   : > { %v2734_v34 = vpop.f32.mrf.mxu0  ;;  %v2736_v35 = vpop.f32.mrf.mxu1 }
 0x11b   : > { %v2738_v36 = vpop.f32.mrf.mxu0  ;;  %v2740_v37 = vpop.f32.mrf.mxu1  ;;  %v2979_v17 = vld [vmem:[#allocation13_spill] sm:$0xff] }
 0x11d   : > { %v2287_v42 = vpop.f32.mrf.mxu0  ;;  %v2319_v43 = vpop.f32.mrf.mxu1 }
 0x11f   : > { %v773_v55 = vpop.f32.mrf.mxu0  ;;  %v901_v32 = vpop.f32.mrf.mxu1 }
 0x121   : > { %v2288_v51 = vpop.f32.mrf.mxu0  ;;  %v2320_v50 = vpop.f32.mrf.mxu1 }
 0x123   : > { %v776_v33 = vpop.f32.mrf.mxu0  ;;  %v904_v3 = vpop.f32.mrf.mxu1 }
 0x125   : > { %v2291_v62 = vpop.f32.mrf.mxu0  ;;  %v2323_v41 = vpop.f32.mrf.mxu1 }
 0x127   : > { %v789_v40 = vpop.f32.mrf.mxu0  ;;  %v917_v47 = vpop.f32.mrf.mxu1 }
 0x129   : > { %v2292_v53 = vpop.f32.mrf.mxu0  ;;  %v2324_v46 = vpop.f32.mrf.mxu1 }
 0x12a   : > { %v947_v52 = vpack.c.bf16 %v2292_v53, %v2291_v62  ;;  %v963_v54 = vpack.c.bf16 %v2324_v46, %v2323_v41  ;;  %v938_v41 = vpack.c.bf16 %v2694_v18, %v2686_v14  ;;  %v954_v46 = vpack.c.bf16 %v2696_v19, %v2688_v15  ;;  %v1523_v53 = vld [vmem:[%s2731_s26 + $0x50] sm:$0xff]  ;;  %v1534_v19 = vld [vmem:[%s2731_s26 + $0xa8] sm:$0xff] }
 0x12b   : > { %v792_v2 = vpop.f32.mrf.mxu0  ;;  %v920_v63 = vpop.f32.mrf.mxu1  ;;  %1597 = vperm.xlu0 %2367, %v1523_v53   ;;  %v936_v62 = vpack.c.bf16 %v2678_v10, %v2670_v6  ;;  %v942_v6 = vpack.c.bf16 %v2738_v36, %v2722_v30  ;;  %v1529_v10 = vld [vmem:[%s2731_s26 + $0x80] sm:$0xff]  ;;  %v957_v14 = vpack.c.bf16 %v2708_v25, %v2700_v21  ;;  %v940_v15 = vpack.c.bf16 %v2711_v26, %v2702_v22  ;;  %v966_v25 = vld [vmem:[%s2608_s22 + $0x10] sm:$0xff] }
 0x12c   : > { %v946_v44 = vpack.c.bf16 %v792_v2, %v789_v40  ;;  %v962_v48 = vpack.c.bf16 %v920_v63, %v917_v47  ;;  %2021 = vmatprep.subr.bf16.mxu1 %v947_v52  ;;  %2133 = vmatprep.subr.bf16.mxu0 %v963_v54  ;;  %v945_v40 = vpack.c.bf16 %v2288_v51, %v2287_v42  ;;  %v1524_v52 = vld [vmem:[%s2731_s26 + $0x58] sm:$0xff]  ;;  %v1526_v51 = vld [vmem:[%s2731_s26 + $0x68] sm:$0xff]  ;;  %v996_v22 = vunpack.c.l.s8.bf16 %v964_v24  ;;  %v2987_v30 = vld [vmem:[#allocation6_spill] sm:$0xff] }
 0x12d   : > { %2022 = vmatpush3.bf16.msra.mxu1 %v939_v45  ;;  %2134 = vmatpush3.bf16.msra.mxu0 %v955_v49  ;;  %v961_v47 = vpack.c.bf16 %v2320_v50, %v2319_v43  ;;  %v953_v45 = vpack.c.bf16 %v2676_v9, %v2668_v5  ;;  %v960_v49 = vpack.c.bf16 %v904_v3, %v901_v32  ;;  %v1525_v50 = vld [vmem:[%s2731_s26 + $0x60] sm:$0xff]  ;;  %v1528_v5 = vld [vmem:[%s2731_s26 + $0x78] sm:$0xff]  ;;  %v1530_v9 = vld [vmem:[%s2731_s26 + $0x88] sm:$0xff]  ;;  %v998_v26 = vunpack.c.l.s8.bf16 %v966_v25 }
 0x12e   : > { %2023 = vmatprep.subr.bf16.mxu1 %v946_v44  ;;  %2135 = vmatprep.subr.bf16.mxu0 %v962_v48  ;;  %v937_v44 = vpack.c.bf16 %v2674_v8, %v2666_v4  ;;  %v944_v48 = vpack.c.bf16 %v776_v33, %v773_v55  ;;  %v952_v4 = vpack.c.bf16 %v2680_v11, %v2672_v7  ;;  %v1527_v8 = vld [vmem:[%s2731_s26 + $0x70] sm:$0xff]  ;;  %v2993_v43 = vld [vmem:[#allocation3_spill] sm:$0xff]  ;;  %v971_v54 = vld [vmem:[%s2608_s22 + $0x38] sm:$0xff]  ;;  %v1000_v2 = vunpack.c.h.s8.bf16 %v964_v24 }
 0x12f   : > { %1602 = vperm.xlu1 %2368, %v1524_v52   ;;  %1607 = vperm.xlu0 %2367, %v1525_v50   ;;  %v943_v55 = vpack.c.bf16 %v2734_v34, %v2717_v28  ;;  %v959_v3 = vpack.c.bf16 %v2736_v35, %v2719_v29  ;;  %v958_v7 = vpack.c.bf16 %v2740_v37, %v2724_v31  ;;  %v1535_v28 = vld [vmem:[%s2731_s26 + $0xb0] sm:$0xff]  ;;  %v2986_v29 = vld [vmem:[#allocation10_spill] sm:$0xff]  ;;  %v2989_v34 = vld [vmem:[#allocation11_spill] sm:$0xff]  ;;  %v1003_v32 = vunpack.c.h.s8.bf16 %v2993_v43 }
 0x130   : > { %v2974_v11 = vpack.c.bf16 %v2650_v60, %v2642_v56  ;;  %v1532_v56 = vld [vmem:[%s2731_s26 + $0x98] sm:$0xff]  ;;  %v1531_v60 = vld [vmem:[%s2731_s26 + $0x90] sm:$0xff]  ;;  %v956_v18 = vpack.c.bf16 %v2979_v17, %v2978_v16  ;;  %v2982_v21 = vpack.c.bf16 %v2980_v58, %v2981_v0  ;;  %v2988_v31 = vpack.c.bf16 %v2986_v29, %v2987_v30  ;;  %v2990_v35 = vld [vmem:[#allocation7_spill] sm:$0xff] }
 0x131   : > { %2024 = vmatpush3.bf16.msra.mxu1 %v938_v41  ;;  %2136 = vmatpush3.bf16.msra.mxu0 %v954_v46  ;;  %v2991_v36 = vpack.c.bf16 %v2989_v34, %v2990_v35  ;;  %v2992_v37 = vld [vmem:[#allocation2_spill] sm:$0xff]  ;;  %v1538_v33 = vld [vmem:[%s2731_s26 + $0xc8] sm:$0xff]  ;;  %v1002_v63 = vunpack.c.h.s8.bf16 %v966_v25  ;;  %v1540_v41 = vld [vmem:[%s2731_s26 + $0xd8] sm:$0xff]  ;;  %v1031_v25 = vunpack.c.l.s8.bf16 %v983_v59  ;;  %v1035_v30 = vunpack.c.h.s8.bf16 %v983_v59 }
 0x132   : > { %2025 = vmatprep.subr.bf16.mxu1 %v945_v40  ;;  %2137 = vmatprep.subr.bf16.mxu0 %v961_v47  ;;  %v1001_v42 = vunpack.c.h.s8.bf16 %v2992_v37  ;;  %v1539_v46 = vld [vmem:[%s2731_s26 + $0xd0] sm:$0xff]  ;;  %v1005_v40 = vunpack.c.l.s8.bf16 %v969_v39  ;;  %v1007_v47 = vunpack.c.l.s8.bf16 %v971_v54  ;;  %v1542_v52 = vld [vmem:[%s2731_s26 + $0xe8] sm:$0xff]  ;;  %v1541_v53 = vld [vmem:[%s2731_s26 + $0xe0] sm:$0xff] }
 0x133   : > { %1612 = vperm.xlu1 %2368, %v1526_v51   ;;  %1617 = vperm.xlu0 %2367, %v1527_v8   ;;  %v1544_v51 = vld [vmem:[%s2731_s26 + $0xf8] sm:$0xff]  ;;  %v1543_v50 = vld [vmem:[%s2731_s26 + $0xf0] sm:$0xff]  ;;  %v976_v17 = vld [vmem:[%s2608_s22 + $0x60] sm:$0xff] }
 0x134   : > { %v1024_v1 = vunpack.c.h.s8.bf16 %v976_v17  ;;  %v987_v34 = vld [vmem:[%s2608_s22 + $0xb8] sm:$0xff]  ;;  %v984_v43 = vld [vmem:[%s2608_s22 + $0xa0] sm:$0xff] }
 0x135   : > { %2026 = vmatpush3.bf16.msra.mxu1 %v937_v44  ;;  %2138 = vmatpush3.bf16.msra.mxu0 %v953_v45  ;;  %v968_v44 = vld [vmem:[%s2608_s22 + $0x20] sm:$0xff]  ;;  %v970_v45 = vld [vmem:[%s2608_s22 + $0x30] sm:$0xff] }
 0x136   : > { %2027 = vmatprep.subr.bf16.mxu1 %v944_v48  ;;  %2139 = vmatprep.subr.bf16.mxu0 %v960_v49  ;;  %v1004_v48 = vunpack.c.l.s8.bf16 %v968_v44  ;;  %v1006_v49 = vunpack.c.l.s8.bf16 %v970_v45  ;;  %v1010_v8 = vunpack.c.h.s8.bf16 %v970_v45 }
 0x137   : > { %1622 = vperm.xlu1 %2368, %v1528_v5   ;;  %1627 = vperm.xlu0 %2367, %v1529_v10   ;;  %v1008_v5 = vunpack.c.h.s8.bf16 %v968_v44  ;;  %v974_v10 = vld [vmem:[%s2608_s22 + $0x50] sm:$0xff] }
 0x139   : > { %2028 = vmatpush3.bf16.msra.mxu1 %v936_v62  ;;  %2140 = vmatpush3.bf16.msra.mxu0 %v952_v4  ;;  %v1009_v62 = vunpack.c.h.s8.bf16 %v969_v39  ;;  %v1011_v4 = vunpack.c.h.s8.bf16 %v971_v54  ;;  %v1043_v54 = vunpack.c.h.s8.bf16 %v987_v34 }
 0x13a   : > { %2029 = vmatprep.subr.bf16.mxu1 %v943_v55  ;;  %2141 = vmatprep.subr.bf16.mxu0 %v959_v3  ;;  %v973_v55 = vld [vmem:[%s2608_s22 + $0x48] sm:$0xff]  ;;  %v975_v3 = vld [vmem:[%s2608_s22 + $0x58] sm:$0xff] }
 0x13b   : > { %1632 = vperm.xlu1 %2368, %v1530_v9   ;;  %1637 = vperm.xlu0 %2367, %v1531_v60   ;;  %v972_v9 = vld [vmem:[%s2608_s22 + $0x40] sm:$0xff]  ;;  %v979_v60 = vld [vmem:[%s2608_s22 + $0x78] sm:$0xff] }
 0x13c   : > { %v1023_v16 = vunpack.c.l.s8.bf16 %v979_v60  ;;  %v1027_v0 = vunpack.c.h.s8.bf16 %v979_v60 }
 0x13d   : > { %2030 = vmatpush3.bf16.msra.mxu1 %v2974_v11  ;;  %2142 = vmatpush3.bf16.msra.mxu0 %v2975_v12  ;;  %v1012_v11 = vunpack.c.l.s8.bf16 %v972_v9  ;;  %v1014_v12 = vunpack.c.l.s8.bf16 %v974_v10 }
 0x13e   : > { %2031 = vmatprep.subr.bf16.mxu1 %v942_v6  ;;  %2143 = vmatprep.subr.bf16.mxu0 %v958_v7  ;;  %v1013_v6 = vunpack.c.l.s8.bf16 %v973_v55  ;;  %v1015_v7 = vunpack.c.l.s8.bf16 %v975_v3 }
 0x13f   : > { %1642 = vperm.xlu1 %2368, %v1532_v56   ;;  %1647 = vperm.xlu0 %2367, %v1533_v20   ;;  %v977_v56 = vld [vmem:[%s2608_s22 + $0x68] sm:$0xff] }
 0x140   : > { %v1025_v58 = vunpack.c.h.s8.bf16 %v977_v56 }
 0x141   : > { %2032 = vmatpush3.bf16.msra.mxu1 %v2976_v57  ;;  %2144 = vmatpush3.bf16.msra.mxu0 %v2977_v61  ;;  %v1016_v57 = vunpack.c.h.s8.bf16 %v972_v9  ;;  %v1018_v61 = vunpack.c.h.s8.bf16 %v974_v10 }
 0x142   : > { %2033 = vmatprep.subr.bf16.mxu1 %v941_v13  ;;  %2145 = vmatprep.subr.bf16.mxu0 %v957_v14  ;;  %v1017_v13 = vunpack.c.h.s8.bf16 %v973_v55  ;;  %v1019_v14 = vunpack.c.h.s8.bf16 %v975_v3 }
 0x143   : > { %1652 = vperm.xlu1 %2368, %v1534_v19   ;;  %1657 = vperm.xlu0 %2367, %v1535_v28   ;;  %v1020_v19 = vunpack.c.l.s8.bf16 %v976_v17 }
 0x145   : > { %2034 = vmatpush3.bf16.msra.mxu1 %v2982_v21  ;;  %2146 = vmatpush3.bf16.msra.mxu0 %v2985_v23  ;;  %v981_v21 = vld [vmem:[%s2608_s22 + $0x88] sm:$0xff] }
 0x146   : > { %2035 = vmatprep.subr.bf16.mxu1 %v940_v15  ;;  %2147 = vmatprep.subr.bf16.mxu0 %v956_v18  ;;  %v1021_v15 = vunpack.c.l.s8.bf16 %v977_v56  ;;  %v978_v18 = vld [vmem:[%s2608_s22 + $0x70] sm:$0xff]  ;;  %v1029_v24 = vunpack.c.l.s8.bf16 %v981_v21  ;;  %v1033_v29 = vunpack.c.h.s8.bf16 %v981_v21 }
 0x147   : > { %1662 = vperm.xlu1 %2368, %v1536_v27   ;;  %1667 = vperm.xlu0 %2367, %v1537_v38   ;;  %v1022_v20 = vunpack.c.l.s8.bf16 %v978_v18  ;;  %v1026_v23 = vunpack.c.h.s8.bf16 %v978_v18 }
 0x149   : > { %2036 = vmatpush3.bf16.msra.mxu1 %v2988_v31  ;;  %2148 = vmatpush3.bf16.msra.mxu0 %v2991_v36  ;;  %v985_v31 = vld [vmem:[%s2608_s22 + $0xa8] sm:$0xff] }
 0x14a   : > { %v1037_v37 = vunpack.c.l.s8.bf16 %v985_v31  ;;  %v1041_v39 = vunpack.c.h.s8.bf16 %v985_v31 }
 0x14b   : > { %1672 = vperm.xlu1 %2368, %v1538_v33   ;;  %1677 = vperm.xlu0 %2367, %v1539_v46   ;;  %v1036_v33 = vunpack.c.l.s8.bf16 %v984_v43 }
 0x14c   : > { %1125 = vmatmul.mubr.bf16.vlgmr.msra.gmra.mxu1 %v996_v22  ;;  %1286 = vmatmul.mubr.bf16.vlgmr.msra.gmra.mxu0 %v998_v26  ;;  %v980_v22 = vld [vmem:[%s2608_s22 + $0x80] sm:$0xff]  ;;  %v982_v26 = vld [vmem:[%s2608_s22 + $0x90] sm:$0xff] }
 0x14d   : > { %1132 = vmatprep.mubr.bf16.mxu1 %v1001_v42  ;;  %1293 = vmatprep.mubr.bf16.mxu0 %v1003_v32  ;;  %v1028_v27 = vunpack.c.l.s8.bf16 %v980_v22  ;;  %v1030_v28 = vunpack.c.l.s8.bf16 %v982_v26  ;;  %v1032_v35 = vunpack.c.h.s8.bf16 %v980_v22  ;;  %v1034_v36 = vunpack.c.h.s8.bf16 %v982_v26  ;;  %v986_v32 = vld [vmem:[%s2608_s22 + $0xb0] sm:$0xff] }
 0x14e   : > { %v1039_v42 = vunpack.c.l.s8.bf16 %v987_v34  ;;  %v1038_v38 = vunpack.c.l.s8.bf16 %v986_v32  ;;  %v1042_v46 = vunpack.c.h.s8.bf16 %v986_v32 }
 0x14f   : > { %1682 = vperm.xlu1 %2368, %v1540_v41   ;;  %1687 = vperm.xlu0 %2367, %v1541_v53   ;;  %v1040_v41 = vunpack.c.h.s8.bf16 %v984_v43  ;;  %v990_v53 = vld [vmem:[%s2608_s22 + $0xd0] sm:$0xff] }
 0x150   : > { %v1046_v45 = vunpack.c.l.s8.bf16 %v990_v53 }
 0x153   : > { %1692 = vperm.xlu1 %2368, %v1542_v52   ;;  %1697 = vperm.xlu0 %2367, %v1543_v50   ;;  %v988_v52 = vld [vmem:[%s2608_s22 + $0xc0] sm:$0xff]  ;;  %v995_v50 = vld [vmem:[%s2608_s22 + $0xf8] sm:$0xff] }
 0x154   : > { %1133 = vmatmul.mubr.bf16.gmra.mxu1 %v1000_v2  ;;  %1294 = vmatmul.mubr.bf16.gmra.mxu0 %v1002_v63  ;;  %v989_v2 = vld [vmem:[%s2608_s22 + $0xc8] sm:$0xff]  ;;  %v991_v63 = vld [vmem:[%s2608_s22 + $0xd8] sm:$0xff]  ;;  %v1044_v44 = vunpack.c.l.s8.bf16 %v988_v52  ;;  %v1055_v3 = vunpack.c.l.s8.bf16 %v995_v50  ;;  %v1059_v10 = vunpack.c.h.s8.bf16 %v995_v50 }
 0x155   : > { %1140 = vmatprep.mubr.bf16.mxu1 %v1005_v40  ;;  %1301 = vmatprep.mubr.bf16.mxu0 %v1007_v47  ;;  %v1045_v40 = vunpack.c.l.s8.bf16 %v989_v2  ;;  %v1047_v47 = vunpack.c.l.s8.bf16 %v991_v63 }
 0x157   : > { %1702 = vperm.xlu1 %2368, %v1544_v51   ;;  %v993_v51 = vld [vmem:[%s2608_s22 + $0xe8] sm:$0xff] }
 0x158   : > { %v1053_v55 = vunpack.c.l.s8.bf16 %v993_v51  ;;  %v1057_v9 = vunpack.c.h.s8.bf16 %v993_v51 }
 0x15c   : > { %1141 = vmatmul.mubr.bf16.gmra.mxu1 %v1004_v48  ;;  %1302 = vmatmul.mubr.bf16.gmra.mxu0 %v1006_v49  ;;  %v1049_v48 = vunpack.c.h.s8.bf16 %v989_v2  ;;  %v1051_v49 = vunpack.c.h.s8.bf16 %v991_v63 }
 0x15d   : > { %1148 = vmatprep.mubr.bf16.mxu1 %v1009_v62  ;;  %1309 = vmatprep.mubr.bf16.mxu0 %v1011_v4  ;;  %v1048_v62 = vunpack.c.h.s8.bf16 %v988_v52  ;;  %v1050_v4 = vunpack.c.h.s8.bf16 %v990_v53 }
 0x164   : > { %1149 = vmatmul.mubr.bf16.gmra.mxu1 %v1008_v5  ;;  %1310 = vmatmul.mubr.bf16.gmra.mxu0 %v1010_v8  ;;  %v992_v5 = vld [vmem:[%s2608_s22 + $0xe0] sm:$0xff]  ;;  %v994_v8 = vld [vmem:[%s2608_s22 + $0xf0] sm:$0xff] }
 0x165   : > { %1156 = vmatprep.mubr.bf16.mxu1 %v1013_v6  ;;  %1317 = vmatprep.mubr.bf16.mxu0 %v1015_v7  ;;  %v1052_v6 = vunpack.c.l.s8.bf16 %v992_v5  ;;  %v1054_v7 = vunpack.c.l.s8.bf16 %v994_v8 }
 0x16c   : > { %1157 = vmatmul.mubr.bf16.gmra.mxu1 %v1012_v11  ;;  %1318 = vmatmul.mubr.bf16.gmra.mxu0 %v1014_v12  ;;  %v1056_v11 = vunpack.c.h.s8.bf16 %v992_v5  ;;  %v1058_v12 = vunpack.c.h.s8.bf16 %v994_v8 }
 0x16d   : > { %1164 = vmatprep.mubr.bf16.mxu1 %v1017_v13  ;;  %1325 = vmatprep.mubr.bf16.mxu0 %v1019_v14 }
 0x174   : > { %1165 = vmatmul.mubr.bf16.gmra.mxu1 %v1016_v57  ;;  %1326 = vmatmul.mubr.bf16.gmra.mxu0 %v1018_v61 }
 0x175   : > { %1172 = vmatprep.mubr.bf16.mxu1 %v1021_v15  ;;  %1333 = vmatprep.mubr.bf16.mxu0 %v1023_v16  ;;  %v1548_v15 = vpop.permute.xlu0 %1547 }
 0x17c   : > { %1173 = vmatmul.mubr.bf16.gmra.mxu1 %v1020_v19  ;;  %1334 = vmatmul.mubr.bf16.gmra.mxu0 %v1022_v20 }
 0x17d   : > { %1180 = vmatprep.mubr.bf16.mxu1 %v1025_v58  ;;  %1341 = vmatprep.mubr.bf16.mxu0 %v1027_v0 }
 0x184   : > { %1181 = vmatmul.mubr.bf16.gmra.mxu1 %v1024_v1  ;;  %1342 = vmatmul.mubr.bf16.gmra.mxu0 %v1026_v23  ;;  %v2864_v1 = vld [vmem:[%s2950_s4] ss:$0 sm:$0xff] }
 0x185   : > { %1188 = vmatprep.mubr.bf16.mxu1 %v1029_v24  ;;  %1349 = vmatprep.mubr.bf16.mxu0 %v1031_v25  ;;  %v1553_v25 = vpop.permute.xlu0 %1552 }
 0x189   : > { %v1568_v8 = vpop.permute.xlu0 %1567 }
 0x18c   : > { %1189 = vmatmul.mubr.bf16.gmra.mxu1 %v1028_v27  ;;  %1350 = vmatmul.mubr.bf16.gmra.mxu0 %v1030_v28 }
 0x18d   : > { %1196 = vmatprep.mubr.bf16.mxu1 %v1033_v29  ;;  %1357 = vmatprep.mubr.bf16.mxu0 %v1035_v30 }
 0x194   : > { %1197 = vmatmul.mubr.bf16.gmra.mxu1 %v1032_v35  ;;  %1358 = vmatmul.mubr.bf16.gmra.mxu0 %v1034_v36 }
 0x195   : > { %1204 = vmatprep.mubr.bf16.mxu1 %v1037_v37  ;;  %1365 = vmatprep.mubr.bf16.mxu0 %v1039_v42  ;;  %v1558_v37 = vpop.permute.xlu1 %1557 }
 0x19c   : > { %1205 = vmatmul.mubr.bf16.gmra.mxu1 %v1036_v33  ;;  %1366 = vmatmul.mubr.bf16.gmra.mxu0 %v1038_v38 }
 0x19d   : > { %1212 = vmatprep.mubr.bf16.mxu1 %v1041_v39  ;;  %1373 = vmatprep.mubr.bf16.mxu0 %v1043_v54 }
 0x1a4   : > { %1213 = vmatmul.mubr.bf16.gmra.mxu1 %v1040_v41  ;;  %1374 = vmatmul.mubr.bf16.gmra.mxu0 %v1042_v46 }
 0x1a5   : > { %1220 = vmatprep.mubr.bf16.mxu1 %v1045_v40  ;;  %1381 = vmatprep.mubr.bf16.mxu0 %v1047_v47 }
 0x1ac   : > { %1221 = vmatmul.mubr.bf16.gmra.mxu1 %v1044_v44  ;;  %1382 = vmatmul.mubr.bf16.gmra.mxu0 %v1046_v45  ;;  %v1563_v44 = vpop.permute.xlu1 %1562 }
 0x1ad   : > { %1228 = vmatprep.mubr.bf16.mxu1 %v1049_v48  ;;  %1389 = vmatprep.mubr.bf16.mxu0 %v1051_v49 }
 0x1b4   : > { %1229 = vmatmul.mubr.bf16.gmra.mxu1 %v1048_v62  ;;  %1390 = vmatmul.mubr.bf16.gmra.mxu0 %v1050_v4 }
 0x1b5   : > { %1236 = vmatprep.mubr.bf16.mxu1 %v1053_v55  ;;  %1397 = vmatprep.mubr.bf16.mxu0 %v1055_v3 }
 0x1bc   : > { %1237 = vmatmul.mubr.bf16.gmra.mxu1 %v1052_v6  ;;  %1398 = vmatmul.mubr.bf16.gmra.mxu0 %v1054_v7 }
 0x1bd   : > { %1244 = vmatprep.mubr.bf16.mxu1 %v1057_v9  ;;  %1405 = vmatprep.mubr.bf16.mxu0 %v1059_v10 }
 0x1c4   : > { %1245 = vmatmul.mubr.bf16.gmra.mxu1 %v1056_v11  ;;  %1406 = vmatmul.mubr.bf16.gmra.mxu0 %v1058_v12 }
 0x20c   : > { %v2037_v13 = vpop.f32.mrf.mxu1  ;;  %v2149_v14 = vpop.f32.mrf.mxu0 }
 0x20e   : > { %v2038_v56 = vpop.f32.mrf.mxu1  ;;  %v2150_v60 = vpop.f32.mrf.mxu0 }
 0x20f   : > { %v2039_v57 = vadd.f32 %v2038_v56, %v2037_v13  ;;  %v2151_v61 = vadd.f32 %v2150_v60, %v2149_v14  ;;  %v1573_v60 = vpop.permute.xlu1 %1572 }
 0x210   : > { %v2040_v16 = vpop.f32.mrf.mxu1  ;;  %v2152_v17 = vpop.f32.mrf.mxu0 }
 0x211   : > { %v1288_v18 = vadd.f32 %v2151_v61, %v2039_v57 }
 0x212   : > { %v2041_v19 = vpop.f32.mrf.mxu1  ;;  %v2153_v20 = vpop.f32.mrf.mxu0 }
 0x213   : > { %v2042_v58 = vadd.f32 %v2041_v19, %v2040_v16  ;;  %v2154_v0 = vadd.f32 %v2153_v20, %v2152_v17  ;;  %v1705_v24 = vmul.f32 %v1548_v15, %v1288_v18 }
 0x214   : > { %v2043_v21 = vpop.f32.mrf.mxu1  ;;  %v2155_v59 = vpop.f32.mrf.mxu0 }
 0x215   : > { %v1291_v23 = vadd.f32 %v2154_v0, %v2042_v58  ;;  %v1744_v29 = vadd.f32 %v2864_v1, %v1705_v24 }
 0x216   : > { %v2044_v22 = vpop.f32.mrf.mxu1  ;;  %v2156_v26 = vpop.f32.mrf.mxu0 }
 0x217   : > { %v2045_v27 = vadd.f32 %v2044_v22, %v2043_v21  ;;  %v2157_v28 = vadd.f32 %v2156_v26, %v2155_v59  ;;  %v1776_v35 = vmax.f32 %v1744_v29, 0.0  ;;  %v1706_v36 = vmul.f32 %v1553_v25, %v1291_v23  ;;  %v1578_v59 = vpop.permute.xlu0 %1577 }
 0x218   : > { %v2046_v30 = vpop.f32.mrf.mxu1  ;;  %v2158_v31 = vpop.f32.mrf.mxu0 }
 0x219   : > { %v1296_v34 = vadd.f32 %v2157_v28, %v2045_v27  ;;  %1808 = vst [vmem:[%s2872_s6] sm:$0xff] %v1776_v35  ;;  %v1745_v38 = vadd.f32 %v2864_v1, %v1706_v36 }
 0x21a   : > { %v2047_v42 = vpop.f32.mrf.mxu1  ;;  %v2159_v43 = vpop.f32.mrf.mxu0 }
 0x21b   : > { %v2048_v32 = vadd.f32 %v2047_v42, %v2046_v30  ;;  %v2160_v33 = vadd.f32 %v2159_v43, %v2158_v31  ;;  %v1777_v63 = vmax.f32 %v1745_v38, 0.0  ;;  %v1707_v41 = vmul.f32 %v1558_v37, %v1296_v34  ;;  %v1583_v31 = vpop.permute.xlu1 %1582 }
 0x21c   : > { %v2049_v39 = vpop.f32.mrf.mxu1  ;;  %v2161_v54 = vpop.f32.mrf.mxu0 }
 0x21d   : > { %v1299_v2 = vadd.f32 %v2160_v33, %v2048_v32  ;;  %1809 = vst [vmem:[%s2872_s6 + $0x8] sm:$0xff] %v1777_v63  ;;  %v1746_v53 = vadd.f32 %v2864_v1, %v1707_v41 }
 0x21e   : > { %v2050_v46 = vpop.f32.mrf.mxu1  ;;  %v2162_v40 = vpop.f32.mrf.mxu0 }
 0x21f   : > { %v2051_v47 = vadd.f32 %v2050_v46, %v2049_v39  ;;  %v2163_v52 = vadd.f32 %v2162_v40, %v2161_v54  ;;  %v1778_v51 = vmax.f32 %v1746_v53, 0.0  ;;  %v1708_v50 = vmul.f32 %v1563_v44, %v1299_v2  ;;  %v1588_v2 = vpop.permute.xlu0 %1587 }
 0x220   : > { %v2052_v45 = vpop.f32.mrf.mxu1  ;;  %v2164_v48 = vpop.f32.mrf.mxu0 }
 0x221   : > { %v1304_v49 = vadd.f32 %v2163_v52, %v2051_v47  ;;  %1810 = vst [vmem:[%s2872_s6 + $0x10] sm:$0xff] %v1778_v51  ;;  %v1747_v5 = vadd.f32 %v2864_v1, %v1708_v50 }
 0x222   : > { %v2053_v62 = vpop.f32.mrf.mxu1  ;;  %v2165_v4 = vpop.f32.mrf.mxu0 }
 0x223   : > { %v2054_v55 = vadd.f32 %v2053_v62, %v2052_v45  ;;  %v2166_v3 = vadd.f32 %v2165_v4, %v2164_v48  ;;  %v1779_v10 = vmax.f32 %v1747_v5, 0.0  ;;  %v1709_v11 = vmul.f32 %v1568_v8, %v1304_v49  ;;  %v1593_v48 = vpop.permute.xlu1 %1592 }
 0x224   : > { %v2055_v6 = vpop.f32.mrf.mxu1  ;;  %v2167_v7 = vpop.f32.mrf.mxu0 }
 0x225   : > { %v1307_v9 = vadd.f32 %v2166_v3, %v2054_v55  ;;  %1811 = vst [vmem:[%s2872_s6 + $0x18] sm:$0xff] %v1779_v10  ;;  %v1748_v57 = vadd.f32 %v2864_v1, %v1709_v11 }
 0x226   : > { %v2056_v12 = vpop.f32.mrf.mxu1  ;;  %v2168_v13 = vpop.f32.mrf.mxu0 }
 0x227   : > { %v2057_v14 = vadd.f32 %v2056_v12, %v2055_v6  ;;  %v2169_v56 = vadd.f32 %v2168_v13, %v2167_v7  ;;  %v1710_v17 = vmul.f32 %v1573_v60, %v1307_v9  ;;  %v1780_v18 = vmax.f32 %v1748_v57, 0.0  ;;  %v1598_v9 = vpop.permute.xlu0 %1597 }
 0x228   : > { %v2058_v61 = vpop.f32.mrf.mxu1  ;;  %v2170_v15 = vpop.f32.mrf.mxu0 }
 0x229   : > { %v1312_v16 = vadd.f32 %v2169_v56, %v2057_v14  ;;  %v1749_v21 = vadd.f32 %v2864_v1, %v1710_v17  ;;  %1812 = vst [vmem:[%s2872_s6 + $0x20] sm:$0xff] %v1780_v18 }
 0x22a   : > { %v2059_v19 = vpop.f32.mrf.mxu1  ;;  %v2171_v20 = vpop.f32.mrf.mxu0 }
 0x22b   : > { %v2060_v58 = vadd.f32 %v2059_v19, %v2058_v61  ;;  %v2172_v0 = vadd.f32 %v2171_v20, %v2170_v15  ;;  %v1781_v22 = vmax.f32 %v1749_v21, 0.0  ;;  %v1711_v26 = vmul.f32 %v1578_v59, %v1312_v16  ;;  %v1603_v15 = vpop.permute.xlu1 %1602 }
 0x22c   : > { %v2061_v23 = vpop.f32.mrf.mxu1  ;;  %v2173_v24 = vpop.f32.mrf.mxu0 }
 0x22d   : > { %v1315_v25 = vadd.f32 %v2172_v0, %v2060_v58  ;;  %1813 = vst [vmem:[%s2872_s6 + $0x28] sm:$0xff] %v1781_v22  ;;  %v1750_v34 = vadd.f32 %v2864_v1, %v1711_v26 }
 0x22e   : > { %v2062_v27 = vpop.f32.mrf.mxu1  ;;  %v2174_v28 = vpop.f32.mrf.mxu0 }
 0x22f   : > { %v2063_v29 = vadd.f32 %v2062_v27, %v2061_v23  ;;  %v2175_v30 = vadd.f32 %v2174_v28, %v2173_v24  ;;  %v1712_v42 = vmul.f32 %v1583_v31, %v1315_v25  ;;  %v1782_v43 = vmax.f32 %v1750_v34, 0.0  ;;  %v1608_v25 = vpop.permute.xlu0 %1607 }
 0x230   : > { %v2064_v35 = vpop.f32.mrf.mxu1  ;;  %v2176_v36 = vpop.f32.mrf.mxu0 }
 0x231   : > { %v1320_v37 = vadd.f32 %v2175_v30, %v2063_v29  ;;  %v1751_v54 = vadd.f32 %v2864_v1, %v1712_v42  ;;  %1814 = vst [vmem:[%s2872_s6 + $0x30] sm:$0xff] %v1782_v43 }
 0x232   : > { %v2065_v32 = vpop.f32.mrf.mxu1  ;;  %v2177_v33 = vpop.f32.mrf.mxu0 }
 0x233   : > { %v2066_v38 = vadd.f32 %v2065_v32, %v2064_v35  ;;  %v2178_v39 = vadd.f32 %v2177_v33, %v2176_v36  ;;  %v1783_v40 = vmax.f32 %v1751_v54, 0.0  ;;  %v1713_v47 = vmul.f32 %v1588_v2, %v1320_v37  ;;  %v1613_v36 = vpop.permute.xlu1 %1612 }
 0x234   : > { %v2067_v63 = vpop.f32.mrf.mxu1  ;;  %v2179_v41 = vpop.f32.mrf.mxu0 }
 0x235   : > { %v1323_v46 = vadd.f32 %v2178_v39, %v2066_v38  ;;  %1815 = vst [vmem:[%s2872_s6 + $0x38] sm:$0xff] %v1783_v40  ;;  %v1752_v49 = vadd.f32 %v2864_v1, %v1713_v47 }
 0x236   : > { %v2068_v52 = vpop.f32.mrf.mxu1  ;;  %v2180_v53 = vpop.f32.mrf.mxu0 }
 0x237   : > { %v2069_v44 = vadd.f32 %v2068_v52, %v2067_v63  ;;  %v2181_v45 = vadd.f32 %v2180_v53, %v2179_v41  ;;  %v1714_v4 = vmul.f32 %v1593_v48, %v1323_v46  ;;  %v1784_v55 = vmax.f32 %v1752_v49, 0.0  ;;  %v1618_v46 = vpop.permute.xlu0 %1617 }
 0x238   : > { %v2070_v51 = vpop.f32.mrf.mxu1  ;;  %v2182_v50 = vpop.f32.mrf.mxu0 }
 0x239   : > { %v1328_v62 = vadd.f32 %v2181_v45, %v2069_v44  ;;  %v1753_v7 = vadd.f32 %v2864_v1, %v1714_v4  ;;  %1816 = vst [vmem:[%s2872_s6 + $0x40] sm:$0xff] %v1784_v55 }
 0x23a   : > { %v2071_v3 = vpop.f32.mrf.mxu1  ;;  %v2183_v5 = vpop.f32.mrf.mxu0 }
 0x23b   : > { %v2072_v8 = vadd.f32 %v2071_v3, %v2070_v51  ;;  %v2184_v6 = vadd.f32 %v2183_v5, %v2182_v50  ;;  %v1785_v13 = vmax.f32 %v1753_v7, 0.0  ;;  %v1715_v14 = vmul.f32 %v1598_v9, %v1328_v62  ;;  %v1623_v50 = vpop.permute.xlu1 %1622 }
 0x23c   : > { %v2073_v10 = vpop.f32.mrf.mxu1  ;;  %v2185_v11 = vpop.f32.mrf.mxu0 }
 0x23d   : > { %v1331_v12 = vadd.f32 %v2184_v6, %v2072_v8  ;;  %1817 = vst [vmem:[%s2872_s6 + $0x48] sm:$0xff] %v1785_v13  ;;  %v1754_v16 = vadd.f32 %v2864_v1, %v1715_v14 }
 0x23e   : > { %v2074_v56 = vpop.f32.mrf.mxu1  ;;  %v2186_v60 = vpop.f32.mrf.mxu0 }
 0x23f   : > { %v2075_v57 = vadd.f32 %v2074_v56, %v2073_v10  ;;  %v2187_v61 = vadd.f32 %v2186_v60, %v2185_v11  ;;  %v1716_v20 = vmul.f32 %v1603_v15, %v1331_v12  ;;  %v1786_v58 = vmax.f32 %v1754_v16, 0.0  ;;  %v1628_v12 = vpop.permute.xlu0 %1627 }
 0x240   : > { %v2076_v17 = vpop.f32.mrf.mxu1  ;;  %v2188_v18 = vpop.f32.mrf.mxu0 }
 0x241   : > { %v1336_v19 = vadd.f32 %v2187_v61, %v2075_v57  ;;  %v1755_v24 = vadd.f32 %v2864_v1, %v1716_v20  ;;  %1818 = vst [vmem:[%s2872_s6 + $0x50] sm:$0xff] %v1786_v58 }
 0x242   : > { %v2077_v0 = vpop.f32.mrf.mxu1  ;;  %v2189_v21 = vpop.f32.mrf.mxu0 }
 0x243   : > { %v2078_v59 = vadd.f32 %v2077_v0, %v2076_v17  ;;  %v2190_v23 = vadd.f32 %v2189_v21, %v2188_v18  ;;  %v1787_v28 = vmax.f32 %v1755_v24, 0.0  ;;  %v1717_v29 = vmul.f32 %v1608_v25, %v1336_v19  ;;  %v1633_v18 = vpop.permute.xlu1 %1632 }
 0x244   : > { %v2079_v22 = vpop.f32.mrf.mxu1  ;;  %v2191_v26 = vpop.f32.mrf.mxu0 }
 0x245   : > { %v1339_v27 = vadd.f32 %v2190_v23, %v2078_v59  ;;  %1819 = vst [vmem:[%s2872_s6 + $0x58] sm:$0xff] %v1787_v28  ;;  %v1756_v37 = vadd.f32 %v2864_v1, %v1717_v29 }
 0x246   : > { %v2080_v30 = vpop.f32.mrf.mxu1  ;;  %v2192_v31 = vpop.f32.mrf.mxu0 }
 0x247   : > { %v2081_v34 = vadd.f32 %v2080_v30, %v2079_v22  ;;  %v2193_v35 = vadd.f32 %v2192_v31, %v2191_v26  ;;  %v1718_v33 = vmul.f32 %v1613_v36, %v1339_v27  ;;  %v1788_v38 = vmax.f32 %v1756_v37, 0.0  ;;  %v1638_v27 = vpop.permute.xlu0 %1637 }
 0x248   : > { %v2082_v42 = vpop.f32.mrf.mxu1  ;;  %v2194_v43 = vpop.f32.mrf.mxu0 }
 0x249   : > { %v1344_v32 = vadd.f32 %v2193_v35, %v2081_v34  ;;  %v1757_v41 = vadd.f32 %v2864_v1, %v1718_v33  ;;  %1820 = vst [vmem:[%s2872_s6 + $0x60] sm:$0xff] %v1788_v38 }
 0x24a   : > { %v2083_v39 = vpop.f32.mrf.mxu1  ;;  %v2195_v54 = vpop.f32.mrf.mxu0 }
 0x24b   : > { %v2084_v2 = vadd.f32 %v2083_v39, %v2082_v42  ;;  %v2196_v63 = vadd.f32 %v2195_v54, %v2194_v43  ;;  %v1789_v53 = vmax.f32 %v1757_v41, 0.0  ;;  %v1719_v44 = vmul.f32 %v1618_v46, %v1344_v32  ;;  %v1643_v43 = vpop.permute.xlu1 %1642 }
 0x24c   : > { %v2085_v40 = vpop.f32.mrf.mxu1  ;;  %v2197_v47 = vpop.f32.mrf.mxu0 }
 0x24d   : > { %v1347_v52 = vadd.f32 %v2196_v63, %v2084_v2  ;;  %1821 = vst [vmem:[%s2872_s6 + $0x68] sm:$0xff] %v1789_v53  ;;  %v1758_v62 = vadd.f32 %v2864_v1, %v1719_v44 }
 0x24e   : > { %v2086_v45 = vpop.f32.mrf.mxu1  ;;  %v2198_v48 = vpop.f32.mrf.mxu0 }
 0x24f   : > { %v2087_v49 = vadd.f32 %v2086_v45, %v2085_v40  ;;  %v2199_v51 = vadd.f32 %v2198_v48, %v2197_v47  ;;  %v1720_v5 = vmul.f32 %v1623_v50, %v1347_v52  ;;  %v1790_v8 = vmax.f32 %v1758_v62, 0.0  ;;  %v1648_v52 = vpop.permute.xlu0 %1647 }
 0x250   : > { %v2088_v4 = vpop.f32.mrf.mxu1  ;;  %v2200_v55 = vpop.f32.mrf.mxu0 }
 0x251   : > { %v1352_v3 = vadd.f32 %v2199_v51, %v2087_v49  ;;  %v1759_v11 = vadd.f32 %v2864_v1, %v1720_v5  ;;  %1822 = vst [vmem:[%s2872_s6 + $0x70] sm:$0xff] %v1790_v8 }
 0x252   : > { %v2089_v6 = vpop.f32.mrf.mxu1  ;;  %v2201_v7 = vpop.f32.mrf.mxu0 }
 0x253   : > { %v2090_v9 = vadd.f32 %v2089_v6, %v2088_v4  ;;  %v2202_v10 = vadd.f32 %v2201_v7, %v2200_v55  ;;  %v1791_v60 = vmax.f32 %v1759_v11, 0.0  ;;  %v1721_v57 = vmul.f32 %v1628_v12, %v1352_v3  ;;  %v1653_v55 = vpop.permute.xlu1 %1652 }
 0x254   : > { %v2091_v13 = vpop.f32.mrf.mxu1  ;;  %v2203_v14 = vpop.f32.mrf.mxu0 }
 0x255   : > { %v1355_v56 = vadd.f32 %v2202_v10, %v2090_v9  ;;  %1823 = vst [vmem:[%s2872_s6 + $0x78] sm:$0xff] %v1791_v60  ;;  %v1760_v19 = vadd.f32 %v2864_v1, %v1721_v57 }
 0x256   : > { %v2092_v61 = vpop.f32.mrf.mxu1  ;;  %v2204_v15 = vpop.f32.mrf.mxu0 }
 0x257   : > { %v2093_v16 = vadd.f32 %v2092_v61, %v2091_v13  ;;  %v2205_v17 = vadd.f32 %v2204_v15, %v2203_v14  ;;  %v1722_v21 = vmul.f32 %v1633_v18, %v1355_v56  ;;  %v1792_v59 = vmax.f32 %v1760_v19, 0.0  ;;  %v1658_v56 = vpop.permute.xlu0 %1657  ;;  %v1663_v19 = vpop.permute.xlu1 %1662 }
 0x258   : > { %v2094_v20 = vpop.f32.mrf.mxu1  ;;  %v2206_v58 = vpop.f32.mrf.mxu0 }
 0x259   : > { %v1360_v0 = vadd.f32 %v2205_v17, %v2093_v16  ;;  %v1761_v26 = vadd.f32 %v2864_v1, %v1722_v21  ;;  %1824 = vst [vmem:[%s2872_s6 + $0x80] sm:$0xff] %v1792_v59 }
 0x25a   : > { %v2095_v23 = vpop.f32.mrf.mxu1  ;;  %v2207_v24 = vpop.f32.mrf.mxu0 }
 0x25b   : > { %v2096_v25 = vadd.f32 %v2095_v23, %v2094_v20  ;;  %v2208_v22 = vadd.f32 %v2207_v24, %v2206_v58  ;;  %v1793_v31 = vmax.f32 %v1761_v26, 0.0  ;;  %v1723_v34 = vmul.f32 %v1638_v27, %v1360_v0 }
 0x25c   : > { %v2097_v28 = vpop.f32.mrf.mxu1  ;;  %v2209_v29 = vpop.f32.mrf.mxu0 }
 0x25d   : > { %v1363_v30 = vadd.f32 %v2208_v22, %v2096_v25  ;;  %1825 = vst [vmem:[%s2872_s6 + $0x88] sm:$0xff] %v1793_v31  ;;  %v1762_v32 = vadd.f32 %v2864_v1, %v1723_v34 }
 0x25e   : > { %v2098_v35 = vpop.f32.mrf.mxu1  ;;  %v2210_v36 = vpop.f32.mrf.mxu0 }
 0x25f   : > { %v2099_v37 = vadd.f32 %v2098_v35, %v2097_v28  ;;  %v2211_v42 = vadd.f32 %v2210_v36, %v2209_v29  ;;  %v1724_v54 = vmul.f32 %v1643_v43, %v1363_v30  ;;  %v1794_v2 = vmax.f32 %v1762_v32, 0.0  ;;  %v1668_v28 = vpop.permute.xlu0 %1667  ;;  %v1673_v32 = vpop.permute.xlu1 %1672 }
 0x260   : > { %v2100_v33 = vpop.f32.mrf.mxu1  ;;  %v2212_v38 = vpop.f32.mrf.mxu0 }
 0x261   : > { %v1368_v39 = vadd.f32 %v2211_v42, %v2099_v37  ;;  %v1763_v47 = vadd.f32 %v2864_v1, %v1724_v54  ;;  %1826 = vst [vmem:[%s2872_s6 + $0x90] sm:$0xff] %v1794_v2 }
 0x262   : > { %v2101_v63 = vpop.f32.mrf.mxu1  ;;  %v2213_v41 = vpop.f32.mrf.mxu0 }
 0x263   : > { %v2102_v46 = vadd.f32 %v2101_v63, %v2100_v33  ;;  %v2214_v40 = vadd.f32 %v2213_v41, %v2212_v38  ;;  %v1795_v48 = vmax.f32 %v1763_v47, 0.0  ;;  %v1725_v49 = vmul.f32 %v1648_v52, %v1368_v39 }
 0x264   : > { %v2103_v53 = vpop.f32.mrf.mxu1  ;;  %v2215_v44 = vpop.f32.mrf.mxu0 }
 0x265   : > { %v1371_v45 = vadd.f32 %v2214_v40, %v2102_v46  ;;  %1827 = vst [vmem:[%s2872_s6 + $0x98] sm:$0xff] %v1795_v48  ;;  %v1764_v3 = vadd.f32 %v2864_v1, %v1725_v49 }
 0x266   : > { %v2104_v51 = vpop.f32.mrf.mxu1  ;;  %v2216_v50 = vpop.f32.mrf.mxu0 }
 0x267   : > { %v2105_v62 = vadd.f32 %v2104_v51, %v2103_v53  ;;  %v2217_v4 = vadd.f32 %v2216_v50, %v2215_v44  ;;  %v1726_v7 = vmul.f32 %v1653_v55, %v1371_v45  ;;  %v1796_v9 = vmax.f32 %v1764_v3, 0.0  ;;  %v1678_v53 = vpop.permute.xlu0 %1677  ;;  %v1683_v3 = vpop.permute.xlu1 %1682 }
 0x268   : > { %v2106_v5 = vpop.f32.mrf.mxu1  ;;  %v2218_v8 = vpop.f32.mrf.mxu0 }
 0x269   : > { %v1376_v6 = vadd.f32 %v2217_v4, %v2105_v62  ;;  %v1765_v12 = vadd.f32 %v2864_v1, %v1726_v7  ;;  %1828 = vst [vmem:[%s2872_s6 + $0xa0] sm:$0xff] %v1796_v9 }
 0x26a   : > { %v2107_v10 = vpop.f32.mrf.mxu1  ;;  %v2219_v11 = vpop.f32.mrf.mxu0 }
 0x26b   : > { %v2108_v13 = vadd.f32 %v2107_v10, %v2106_v5  ;;  %v2220_v14 = vadd.f32 %v2219_v11, %v2218_v8  ;;  %v1797_v61 = vmax.f32 %v1765_v12, 0.0  ;;  %v1727_v16 = vmul.f32 %v1658_v56, %v1376_v6  ;;  %v1688_v56 = vpop.permute.xlu0 %1687 }
 0x26c   : > { %v2109_v60 = vpop.f32.mrf.mxu1  ;;  %v2221_v57 = vpop.f32.mrf.mxu0 }
 0x26d   : > { %v1379_v15 = vadd.f32 %v2220_v14, %v2108_v13  ;;  %1829 = vst [vmem:[%s2872_s6 + $0xa8] sm:$0xff] %v1797_v61  ;;  %v1766_v20 = vadd.f32 %v2864_v1, %v1727_v16 }
 0x26e   : > { %v2110_v17 = vpop.f32.mrf.mxu1  ;;  %v2222_v18 = vpop.f32.mrf.mxu0 }
 0x26f   : > { %v2111_v58 = vadd.f32 %v2110_v17, %v2109_v60  ;;  %v2223_v0 = vadd.f32 %v2222_v18, %v2221_v57  ;;  %v1728_v23 = vmul.f32 %v1663_v19, %v1379_v15  ;;  %v1798_v24 = vmax.f32 %v1766_v20, 0.0 }
 0x270   : > { %v2112_v21 = vpop.f32.mrf.mxu1  ;;  %v2224_v59 = vpop.f32.mrf.mxu0 }
 0x271   : > { %v1384_v25 = vadd.f32 %v2223_v0, %v2111_v58  ;;  %v1767_v27 = vadd.f32 %v2864_v1, %v1728_v23  ;;  %1830 = vst [vmem:[%s2872_s6 + $0xb0] sm:$0xff] %v1798_v24  ;;  %v1693_v0 = vpop.permute.xlu1 %1692 }
 0x272   : > { %v2113_v22 = vpop.f32.mrf.mxu1  ;;  %v2225_v26 = vpop.f32.mrf.mxu0 }
 0x273   : > { %v2114_v29 = vadd.f32 %v2113_v22, %v2112_v21  ;;  %v2226_v30 = vadd.f32 %v2225_v26, %v2224_v59  ;;  %v1799_v35 = vmax.f32 %v1767_v27, 0.0  ;;  %v1729_v36 = vmul.f32 %v1668_v28, %v1384_v25 }
 0x274   : > { %v2115_v31 = vpop.f32.mrf.mxu1  ;;  %v2227_v34 = vpop.f32.mrf.mxu0 }
 0x275   : > { %v1387_v37 = vadd.f32 %v2226_v30, %v2114_v29  ;;  %1831 = vst [vmem:[%s2872_s6 + $0xb8] sm:$0xff] %v1799_v35  ;;  %v1768_v33 = vadd.f32 %v2864_v1, %v1729_v36  ;;  %v1698_v35 = vpop.permute.xlu0 %1697 }
 0x276   : > { %v2116_v42 = vpop.f32.mrf.mxu1  ;;  %v2228_v43 = vpop.f32.mrf.mxu0 }
 0x277   : > { %v2117_v38 = vadd.f32 %v2116_v42, %v2115_v31  ;;  %v2229_v39 = vadd.f32 %v2228_v43, %v2227_v34  ;;  %v1800_v63 = vmax.f32 %v1768_v33, 0.0  ;;  %v1730_v41 = vmul.f32 %v1673_v32, %v1387_v37  ;;  %v1703_v32 = vpop.permute.xlu1 %1702 }
 0x278   : > { %v2118_v54 = vpop.f32.mrf.mxu1  ;;  %v2230_v2 = vpop.f32.mrf.mxu0 }
 0x279   : > { %v1392_v46 = vadd.f32 %v2229_v39, %v2117_v38  ;;  %1832 = vst [vmem:[%s2872_s6 + $0xc0] sm:$0xff] %v1800_v63  ;;  %v1769_v52 = vadd.f32 %v2864_v1, %v1730_v41 }
 0x27a   : > { %v2119_v40 = vpop.f32.mrf.mxu1  ;;  %v2231_v47 = vpop.f32.mrf.mxu0 }
 0x27b   : > { %v2120_v44 = vadd.f32 %v2119_v40, %v2118_v54  ;;  %v2232_v45 = vadd.f32 %v2231_v47, %v2230_v2  ;;  %v1801_v51 = vmax.f32 %v1769_v52, 0.0  ;;  %v1731_v50 = vmul.f32 %v1678_v53, %v1392_v46 }
 0x27c   : > { %v2121_v48 = vpop.f32.mrf.mxu1  ;;  %v2233_v49 = vpop.f32.mrf.mxu0 }
 0x27d   : > { %v1395_v62 = vadd.f32 %v2232_v45, %v2120_v44  ;;  %1833 = vst [vmem:[%s2872_s6 + $0xc8] sm:$0xff] %v1801_v51  ;;  %v1770_v5 = vadd.f32 %v2864_v1, %v1731_v50 }
 0x27e   : > { %v2122_v4 = vpop.f32.mrf.mxu1  ;;  %v2234_v55 = vpop.f32.mrf.mxu0 }
 0x27f   : > { %v2123_v8 = vadd.f32 %v2122_v4, %v2121_v48  ;;  %v2235_v6 = vadd.f32 %v2234_v55, %v2233_v49  ;;  %v1802_v10 = vmax.f32 %v1770_v5, 0.0  ;;  %v1732_v11 = vmul.f32 %v1683_v3, %v1395_v62 }
 0x280   : > { %v2124_v7 = vpop.f32.mrf.mxu1  ;;  %v2236_v9 = vpop.f32.mrf.mxu0 }
 0x281   : > { %v1400_v12 = vadd.f32 %v2235_v6, %v2123_v8  ;;  %1834 = vst [vmem:[%s2872_s6 + $0xd0] sm:$0xff] %v1802_v10  ;;  %v1771_v60 = vadd.f32 %v2864_v1, %v1732_v11 }
 0x282   : > { %v2125_v13 = vpop.f32.mrf.mxu1  ;;  %v2237_v14 = vpop.f32.mrf.mxu0 }
 0x283   : > { %v2126_v57 = vadd.f32 %v2125_v13, %v2124_v7  ;;  %v2238_v61 = vadd.f32 %v2237_v14, %v2236_v9  ;;  %v1803_v17 = vmax.f32 %v1771_v60, 0.0  ;;  %v1733_v18 = vmul.f32 %v1688_v56, %v1400_v12 }
 0x284   : > { %v2127_v15 = vpop.f32.mrf.mxu1  ;;  %v2239_v16 = vpop.f32.mrf.mxu0 }
 0x285   : > { %v1403_v19 = vadd.f32 %v2238_v61, %v2126_v57  ;;  %1835 = vst [vmem:[%s2872_s6 + $0xd8] sm:$0xff] %v1803_v17  ;;  %v1772_v21 = vadd.f32 %v2864_v1, %v1733_v18 }
 0x286   : > { %v2128_v20 = vpop.f32.mrf.mxu1  ;;  %v2240_v58 = vpop.f32.mrf.mxu0 }
 0x287   : > { %v2129_v59 = vadd.f32 %v2128_v20, %v2127_v15  ;;  %v2241_v23 = vadd.f32 %v2240_v58, %v2239_v16  ;;  %v1804_v22 = vmax.f32 %v1772_v21, 0.0  ;;  %v1734_v26 = vmul.f32 %v1693_v0, %v1403_v19 }
 0x288   : > { %v2130_v24 = vpop.f32.mrf.mxu1  ;;  %v2242_v25 = vpop.f32.mrf.mxu0 }
 0x289   : > { %v1408_v27 = vadd.f32 %v2241_v23, %v2129_v59  ;;  %1836 = vst [vmem:[%s2872_s6 + $0xe0] sm:$0xff] %v1804_v22  ;;  %v1773_v30 = vadd.f32 %v2864_v1, %v1734_v26 }
 0x28a   : > { %v2131_v28 = vpop.f32.mrf.mxu1  ;;  %v2243_v29 = vpop.f32.mrf.mxu0 }
 0x28b   : > { %v2132_v31 = vadd.f32 %v2131_v28, %v2130_v24  ;;  %v2244_v34 = vadd.f32 %v2243_v29, %v2242_v25  ;;  %v1805_v36 = vmax.f32 %v1773_v30, 0.0  ;;  %v1735_v37 = vmul.f32 %v1698_v35, %v1408_v27 }
 0x28d   : > { %v1411_v42 = vadd.f32 %v2244_v34, %v2132_v31  ;;  %1837 = vst [vmem:[%s2872_s6 + $0xe8] sm:$0xff] %v1805_v36  ;;  %v1774_v43 = vadd.f32 %v2864_v1, %v1735_v37 }
 0x28f   : > { %v1806_v33 = vmax.f32 %v1774_v43, 0.0  ;;  %v1736_v38 = vmul.f32 %v1703_v32, %v1411_v42 }
 0x291   : > { %1838 = vst [vmem:[%s2872_s6 + $0xf0] sm:$0xff] %v1806_v33  ;;  %v1775_v39 = vadd.f32 %v2864_v1, %v1736_v38 }
 0x293   : > { %v1807_v54 = vmax.f32 %v1775_v39, 0.0 }
 0x295   : > { %1839 = vst [vmem:[%s2872_s6 + $0xf8] sm:$0xff] %v1807_v54 }
 0x296 PF: > { %s15_s20 = sadd.s32 1, %s2431_s20   ;;  %s2994_s18 = smov %s2427_s19 }
 0x297   : > { %p12_p6 = scmp.ge.s32.totalorder %s15_s20, 4   ;;  %s2995_s19 = smov %s2997_s21 }
 0x299   :  { %14 = sbr.rel (!%p12_p6) target bundleno = 2 (0x2), region = 82 }

</bundles_post_ra>
